<compile_context>
chip_gen: v7x
topology: tpu7x:2x2x1
jax: 0.10.0
libtpu: 0.0.40
codegen_flags: <defaults>
</compile_context>

<pallas_src>
import jax
import jax.numpy as jnp
from jax.experimental import pallas as pl
from jax.experimental.pallas import tpu as pltpu


def _policy_head_kernel(x_ref, scale_ref, shift_ref, w_ref, b_ref, o_ref):
    # Folded BatchRenorm2d (eval): per-element scale/shift (pre-tiled per channel).
    y = x_ref[...] * scale_ref[...] + shift_ref[...]
    # Mish: y * tanh(softplus(y))
    y = y * jnp.tanh(jax.nn.softplus(y))
    # Fused (1x1 conv -> flatten -> fc): one (B, H*W*C) x (H*W*C, 3) MXU matmul.
    out = jnp.dot(y, w_ref[...], preferred_element_type=jnp.float32)
    o_ref[...] = (out + b_ref[...]).astype(o_ref.dtype)


def policy_head(x_nchw, params):
    """Eval-mode forward of PolicyHead.  x_nchw: (B, C, 19, 19) f32 -> (B, 3)."""
    B, C, H, W = x_nchw.shape
    HWC = H * W * C
    n_out = params["fc_w"].shape[0]

    # NCHW -> NHWC -> (B, H*W*C): lane-dense activation slab (wrapper-side reshape).
    x_flat = jnp.transpose(x_nchw, (0, 2, 3, 1)).reshape(B, HWC).astype(jnp.float32)

    # Fold BatchRenorm (eval) + affine into per-channel scale/shift, tiled to HWC.
    inv_std = 1.0 / params["running_std"]
    scale_c = params["norm_weight"] * inv_std
    shift_c = params["norm_bias"] - params["norm_weight"] * params["running_mean"] * inv_std
    scale = jnp.tile(scale_c, H * W).reshape(1, HWC)
    shift = jnp.tile(shift_c, H * W).reshape(1, HWC)

    # Fold the 1x1 conv (C -> 1, no bias) into the fc weight:
    #   out[b,k] = sum_{h,w,c} mish[b,h,w,c] * conv[c] * fc_w[k, h*W+w] + fc_b[k]
    conv_vec = params["conv_w"][0, :, 0, 0]                                   # (C,)
    w_comb = (params["fc_w"].T[:, None, :] * conv_vec[None, :, None]).reshape(HWC, n_out)
    b_fc = params["fc_b"].reshape(1, n_out)

    out = pl.pallas_call(
        _policy_head_kernel,
        out_shape=jax.ShapeDtypeStruct((B, n_out), jnp.float32),
        grid=(1,),
        in_specs=[
            pl.BlockSpec((B, HWC), lambda i: (0, 0)),
            pl.BlockSpec((1, HWC), lambda i: (0, 0)),
            pl.BlockSpec((1, HWC), lambda i: (0, 0)),
            pl.BlockSpec((HWC, n_out), lambda i: (0, 0)),
            pl.BlockSpec((1, n_out), lambda i: (0, 0)),
        ],
        out_specs=pl.BlockSpec((B, n_out), lambda i: (0, 0)),
        compiler_params=pltpu.CompilerParams(
            dimension_semantics=("arbitrary",)),
    )(x_flat, scale, shift, w_comb, b_fc)
    return out


def reference(x, params):
    """Pure-JAX NCHW reference of PolicyHead (eval mode)."""
    rm = params["running_mean"][None, :, None, None]
    rs = params["running_std"][None, :, None, None]
    g = params["norm_weight"][None, :, None, None]
    b = params["norm_bias"][None, :, None, None]
    y = g * ((x - rm) / rs) + b
    y = y * jnp.tanh(jax.nn.softplus(y))
    z = jax.lax.conv_general_dilated(
        y, params["conv_w"], (1, 1), "VALID",
        dimension_numbers=("NCHW", "OIHW", "NCHW"),
        precision=jax.lax.Precision.HIGHEST)               # (B, 1, H, W)
    z = z.reshape(z.shape[0], -1)                           # (B, H*W)
    return jnp.dot(z, params["fc_w"].T,
                   precision=jax.lax.Precision.HIGHEST) + params["fc_b"]


if __name__ == "__main__":
    key = jax.random.PRNGKey(0)
    B, C, H, W = 2, 8, 19, 19          # fc is Linear(1*19*19, 3) -> spatial must be 19
    keys = jax.random.split(key, 8)

    x = jax.random.normal(keys[0], (B, C, H, W), jnp.float32)
    params = dict(
        norm_weight=1.0 + 0.1 * jax.random.normal(keys[1], (C,), jnp.float32),
        norm_bias=0.1 * jax.random.normal(keys[2], (C,), jnp.float32),
        running_mean=0.1 * jax.random.normal(keys[3], (C,), jnp.float32),
        running_std=1.0 + 0.1 * jax.random.uniform(keys[4], (C,), jnp.float32),
        conv_w=0.1 * jax.random.normal(keys[5], (1, C, 1, 1), jnp.float32),
        fc_w=0.1 * jax.random.normal(keys[6], (3, H * W), jnp.float32),
        fc_b=0.1 * jax.random.normal(keys[7], (3,), jnp.float32),
    )

    out = policy_head(x, params)
    out = jax.block_until_ready(out)

    ref = reference(x, params)
    assert out.shape == (B, 3)
    if not jnp.allclose(out, ref, rtol=1e-2, atol=1e-2):
        max_err = float(jnp.max(jnp.abs(out - ref)))
        raise AssertionError(f"Pallas kernel mismatch vs reference, max_err={max_err}")

    print("KERNEL_OK")
</pallas_src>

<mosaic_0001>
module attributes {stable_mosaic.version = 11 : i64} {
  func.func @_policy_head_kernel(%arg0: i32, %arg1: memref<2x2888xf32, #tpu.memory_space<vmem>>, %arg2: memref<1x2888xf32, #tpu.memory_space<vmem>>, %arg3: memref<1x2888xf32, #tpu.memory_space<vmem>>, %arg4: memref<2888x3xf32, #tpu.memory_space<vmem>>, %arg5: memref<1x3xf32, #tpu.memory_space<vmem>>, %arg6: memref<2x3xf32, #tpu.memory_space<vmem>>) attributes {dimension_semantics = [#tpu.dimension_semantics<arbitrary>], iteration_bounds = array<i64: 1>, scalar_prefetch = 0 : i64, scratch_operands = 0 : i64, tpu.core_type = #tpu.core_type<tc>, window_params = [{pipeline_mode = #tpu.pipeline_mode<synchronous>, transform_indices = @transform_0, window_bounds = array<i64: 2, 2888>}, {pipeline_mode = #tpu.pipeline_mode<synchronous>, transform_indices = @transform_1, window_bounds = array<i64: 1, 2888>}, {pipeline_mode = #tpu.pipeline_mode<synchronous>, transform_indices = @transform_2, window_bounds = array<i64: 1, 2888>}, {pipeline_mode = #tpu.pipeline_mode<synchronous>, transform_indices = @transform_3, window_bounds = array<i64: 2888, 3>}, {pipeline_mode = #tpu.pipeline_mode<synchronous>, transform_indices = @transform_4, window_bounds = array<i64: 1, 3>}, {pipeline_mode = #tpu.pipeline_mode<synchronous>, transform_indices = @transform_5, window_bounds = array<i64: 2, 3>}]} {
    %c0 = arith.constant 0 : index
    %c0_0 = arith.constant 0 : index
    %0 = vector.load %arg1[%c0, %c0_0] : memref<2x2888xf32, #tpu.memory_space<vmem>>, vector<2x2888xf32>
    %c0_1 = arith.constant 0 : index
    %c0_2 = arith.constant 0 : index
    %1 = vector.load %arg2[%c0_1, %c0_2] : memref<1x2888xf32, #tpu.memory_space<vmem>>, vector<1x2888xf32>
    %2 = vector.broadcast %1 : vector<1x2888xf32> to vector<2x2888xf32>
    %3 = arith.mulf %0, %2 : vector<2x2888xf32>
    %c0_3 = arith.constant 0 : index
    %c0_4 = arith.constant 0 : index
    %4 = vector.load %arg3[%c0_3, %c0_4] : memref<1x2888xf32, #tpu.memory_space<vmem>>, vector<1x2888xf32>
    %5 = vector.broadcast %4 : vector<1x2888xf32> to vector<2x2888xf32>
    %6 = arith.addf %3, %5 : vector<2x2888xf32>
    %cst = arith.constant 0.000000e+00 : f32
    %7 = vector.broadcast %cst : f32 to vector<2x2888xf32>
    %8 = arith.maximumf %6, %7 : vector<2x2888xf32>
    %9 = vector.broadcast %cst : f32 to vector<2x2888xf32>
    %10 = arith.subf %6, %9 : vector<2x2888xf32>
    %11 = arith.cmpf one, %10, %10 : vector<2x2888xf32>
    %12 = vector.broadcast %cst : f32 to vector<2x2888xf32>
    %13 = arith.addf %6, %12 : vector<2x2888xf32>
    %14 = math.absf %10 : vector<2x2888xf32>
    %cst_5 = arith.constant 0.000000e+00 : f32
    %15 = vector.broadcast %cst_5 : f32 to vector<2x2888xf32>
    %16 = arith.subf %15, %14 : vector<2x2888xf32>
    %17 = math.exp %16 : vector<2x2888xf32>
    %18 = math.log1p %17 : vector<2x2888xf32>
    %19 = arith.addf %8, %18 : vector<2x2888xf32>
    %20 = arith.select %11, %13, %19 : vector<2x2888xi1>, vector<2x2888xf32>
    %21 = math.tanh %20 : vector<2x2888xf32>
    %22 = arith.mulf %6, %21 : vector<2x2888xf32>
    %c0_6 = arith.constant 0 : index
    %c0_7 = arith.constant 0 : index
    %23 = vector.load %arg4[%c0_6, %c0_7] : memref<2888x3xf32, #tpu.memory_space<vmem>>, vector<2888x3xf32>
    %cst_8 = arith.constant dense<0.000000e+00> : vector<2x3xf32>
    %24 = tpu.matmul %22, %23, %cst_8 {dimension_numbers = #tpu.dot_dimension_numbers<[1], [0], [0], [1], [0, 0, 1, 1], [], []>} : vector<2x2888xf32>, vector<2888x3xf32>, vector<2x3xf32> -> vector<2x3xf32>
    %c0_9 = arith.constant 0 : index
    %c0_10 = arith.constant 0 : index
    %25 = vector.load %arg5[%c0_9, %c0_10] : memref<1x3xf32, #tpu.memory_space<vmem>>, vector<1x3xf32>
    %26 = vector.broadcast %25 : vector<1x3xf32> to vector<2x3xf32>
    %27 = arith.addf %24, %26 : vector<2x3xf32>
    %c0_11 = arith.constant 0 : index
    %c0_12 = arith.constant 0 : index
    %28 = vector.load %arg6[%c0_11, %c0_12] : memref<2x3xf32, #tpu.memory_space<vmem>>, vector<2x3xf32>
    tpu.vector_store %arg6[%c0_11, %c0_12], %27 {strides = array<i32>} : memref<2x3xf32, #tpu.memory_space<vmem>>, vector<2x3xf32>,
    return
  }
  func.func @transform_0(%arg0: i32) -> (i32, i32) {
    %c0_i32 = arith.constant 0 : i32
    %c0_i32_0 = arith.constant 0 : i32
    %c0_i32_1 = arith.constant 0 : i32
    return %c0_i32, %c0_i32_0 : i32, i32
  }
  func.func @transform_1(%arg0: i32) -> (i32, i32) {
    %c0_i32 = arith.constant 0 : i32
    %c0_i32_0 = arith.constant 0 : i32
    %c0_i32_1 = arith.constant 0 : i32
    return %c0_i32, %c0_i32_0 : i32, i32
  }
  func.func @transform_2(%arg0: i32) -> (i32, i32) {
    %c0_i32 = arith.constant 0 : i32
    %c0_i32_0 = arith.constant 0 : i32
    %c0_i32_1 = arith.constant 0 : i32
    return %c0_i32, %c0_i32_0 : i32, i32
  }
  func.func @transform_3(%arg0: i32) -> (i32, i32) {
    %c0_i32 = arith.constant 0 : i32
    %c0_i32_0 = arith.constant 0 : i32
    %c0_i32_1 = arith.constant 0 : i32
    return %c0_i32, %c0_i32_0 : i32, i32
  }
  func.func @transform_4(%arg0: i32) -> (i32, i32) {
    %c0_i32 = arith.constant 0 : i32
    %c0_i32_0 = arith.constant 0 : i32
    %c0_i32_1 = arith.constant 0 : i32
    return %c0_i32, %c0_i32_0 : i32, i32
  }
  func.func @transform_5(%arg0: i32) -> (i32, i32) {
    %c0_i32 = arith.constant 0 : i32
    %c0_i32_0 = arith.constant 0 : i32
    %c0_i32_1 = arith.constant 0 : i32
    return %c0_i32, %c0_i32_0 : i32, i32
  }
}

</mosaic_0001>

<bundles_post_ra>
// kernel: tpu_custom_call.1
= control target key start
LH: loop header
LB: loop body
LE: loop exit
PB: predicated region body
PF: predicated region fallthrough
CT: control target
= control target key end

     0   :  { %v33_v47 = vlaneseq  ;;  %v2772_v52 = vmov 1983009808   ;;  %s4327_s0 = inlined_call_operand.vmem [shape: f32[2,2888], index: 0, kind: input, shape index: {}]   ;;  %s4328_s1 = inlined_call_operand.vmem [shape: f32[1,2888], index: 1, kind: input, shape index: {}]   ;;  %s4329_s2 = inlined_call_operand.vmem [shape: f32[1,2888], index: 2, kind: input, shape index: {}]   ;;  %s4330_s3 = inlined_call_operand.vmem [shape: f32[2888,3], index: 3, kind: input, shape index: {}]   ;;  %s4331_s4 = inlined_call_operand.vmem [shape: f32[1,3], index: 4, kind: input, shape index: {}]   ;;  %s4332_s5 = inlined_call_operand.hbm [shape: f32[2,3], index: 5, kind: output, shape index: {}]  }
   0x1   :  { %v585_v0 = vld [vmem:[%s4330_s3 + $0x80] sm:$0xff]  ;;  %v586_v1 = vld [vmem:[%s4330_s3 + $0x88] sm:$0xff]  ;;  %v587_v11 = vld [vmem:[%s4330_s3 + $0x90] sm:$0xff]  ;;  %v128_v53 = vunpack.c.l.s4 %v2772_v52 }
   0x2   :  { %v569_v2 = vld [vmem:[%s4330_s3] sm:$0xff]  ;;  %v2343_v3 = vpack.c.bf16 %v586_v1, %v585_v0  ;;  %v570_v4 = vld [vmem:[%s4330_s3 + $0x8] sm:$0xff]  ;;  %v588_v13 = vld [vmem:[%s4330_s3 + $0x98] sm:$0xff]  ;;  %v2933_v63 = vshrl.u32 %v33_v47, 7 }
   0x3   :  { %v617_v5 = vld [vmem:[%s4330_s3 + $0x180] sm:$0xff]  ;;  %v618_v6 = vld [vmem:[%s4330_s3 + $0x188] sm:$0xff]  ;;  %v2345_v7 = vpack.c.bf16 %v570_v4, %v569_v2  ;;  %v571_v14 = vld [vmem:[%s4330_s3 + $0x10] sm:$0xff]  ;;  %v2347_v16 = vpack.c.bf16 %v588_v13, %v587_v11 }
   0x4   :  { %v2375_v8 = vpack.c.bf16 %v618_v6, %v617_v5  ;;  %v601_v9 = vld [vmem:[%s4330_s3 + $0x100] sm:$0xff]  ;;  %v602_v10 = vld [vmem:[%s4330_s3 + $0x108] sm:$0xff]  ;;  %2344 = vmatprep.subr.bf16.mxu0 %v2343_v3  ;;  %v572_v15 = vld [vmem:[%s4330_s3 + $0x18] sm:$0xff]  ;;  %v129_v3 = vunpack.c.0.s8 %v128_v53  ;;  %v2960_v13 = vsub.s32 0, %v2933_v63  ;;  %v3046_v53 = vsub.s32 6, %v2933_v63 }
   0x5   :  { %v2377_v12 = vpack.c.bf16 %v602_v10, %v601_v9  ;;  %2346 = vmatpush3.bf16.msra.mxu0 %v2345_v7  ;;  %v2349_v17 = vpack.c.bf16 %v572_v15, %v571_v14  ;;  %v619_v18 = vld [vmem:[%s4330_s3 + $0x190] sm:$0xff]  ;;  %v620_v19 = vld [vmem:[%s4330_s3 + $0x198] sm:$0xff]  ;;  %v589_v23 = vld [vmem:[%s4330_s3 + $0xa0] sm:$0xff]  ;;  %v2963_v14 = vsub.s32 1, %v2933_v63  ;;  %v2966_v15 = vsub.s32 2, %v2933_v63 }
   0x6   :  { %2376 = vmatprep.subr.bf16.mxu1 %v2375_v8  ;;  %v603_v20 = vld [vmem:[%s4330_s3 + $0x110] sm:$0xff]  ;;  %v2379_v21 = vpack.c.bf16 %v620_v19, %v619_v18  ;;  %v604_v22 = vld [vmem:[%s4330_s3 + $0x118] sm:$0xff]  ;;  %v590_v24 = vld [vmem:[%s4330_s3 + $0xa8] sm:$0xff]  ;;  %2348 = vmatprep.subr.bf16.mxu0 %v2347_v16  ;;  %v2975_v18 = vsub.s32 3, %v2933_v63 }
   0x7   :  { %2378 = vmatpush3.bf16.msra.mxu1 %v2377_v12  ;;  %v2381_v25 = vpack.c.bf16 %v604_v22, %v603_v20  ;;  %v2351_v26 = vpack.c.bf16 %v590_v24, %v589_v23  ;;  %v573_v27 = vld [vmem:[%s4330_s3 + $0x20] sm:$0xff]  ;;  %v574_v28 = vld [vmem:[%s4330_s3 + $0x28] sm:$0xff]  ;;  %v591_v35 = vld [vmem:[%s4330_s3 + $0xb0] sm:$0xff]  ;;  %v2984_v22 = vsub.s32 %v129_v3, %v2933_v63 }
   0x8   :  { %v621_v29 = vld [vmem:[%s4330_s3 + $0x1a0] sm:$0xff]  ;;  %2380 = vmatprep.subr.bf16.mxu1 %v2379_v21  ;;  %v622_v30 = vld [vmem:[%s4330_s3 + $0x1a8] sm:$0xff]  ;;  %v2353_v33 = vpack.c.bf16 %v574_v28, %v573_v27  ;;  %v592_v36 = vld [vmem:[%s4330_s3 + $0xb8] sm:$0xff]  ;;  %v2998_v28 = vsub.s32 4, %v2933_v63 }
   0x9   :  { %v605_v31 = vld [vmem:[%s4330_s3 + $0x120] sm:$0xff]  ;;  %v606_v32 = vld [vmem:[%s4330_s3 + $0x128] sm:$0xff]  ;;  %2350 = vmatpush3.bf16.msra.mxu0 %v2349_v17  ;;  %v2383_v34 = vpack.c.bf16 %v622_v30, %v621_v29  ;;  %v575_v37 = vld [vmem:[%s4330_s3 + $0x30] sm:$0xff]  ;;  %v2355_v39 = vpack.c.bf16 %v592_v36, %v591_v35  ;;  %v3001_v29 = vsub.s32 5, %v2933_v63 }
   0xa   :  { %2352 = vmatprep.subr.bf16.mxu0 %v2351_v26  ;;  %v2385_v38 = vpack.c.bf16 %v606_v32, %v605_v31  ;;  %v576_v40 = vld [vmem:[%s4330_s3 + $0x38] sm:$0xff]  ;;  %v623_v41 = vld [vmem:[%s4330_s3 + $0x1b0] sm:$0xff]  ;;  %v593_v46 = vld [vmem:[%s4330_s3 + $0xc0] sm:$0xff] }
   0xb   :  { %2382 = vmatpush3.bf16.msra.mxu1 %v2381_v25  ;;  %v624_v42 = vld [vmem:[%s4330_s3 + $0x1b8] sm:$0xff]  ;;  %v607_v44 = vld [vmem:[%s4330_s3 + $0x130] sm:$0xff]  ;;  %v594_v48 = vld [vmem:[%s4330_s3 + $0xc8] sm:$0xff]  ;;  %v2357_v49 = vpack.c.bf16 %v576_v40, %v575_v37 }
   0xc   :  { %2384 = vmatprep.subr.bf16.mxu1 %v2383_v34  ;;  %v2387_v43 = vpack.c.bf16 %v624_v42, %v623_v41  ;;  %v608_v45 = vld [vmem:[%s4330_s3 + $0x138] sm:$0xff]  ;;  %v625_v50 = vld [vmem:[%s4330_s3 + $0x1c0] sm:$0xff]  ;;  %v626_v51 = vld [vmem:[%s4330_s3 + $0x1c8] sm:$0xff]  ;;  %v2359_v55 = vpack.c.bf16 %v594_v48, %v593_v46 }
   0xd   :  { %2354 = vmatpush3.bf16.msra.mxu0 %v2353_v33  ;;  %v2389_v54 = vpack.c.bf16 %v608_v45, %v607_v44  ;;  %v577_v56 = vld [vmem:[%s4330_s3 + $0x40] sm:$0xff]  ;;  %v578_v57 = vld [vmem:[%s4330_s3 + $0x48] sm:$0xff]  ;;  %v2391_v59 = vpack.c.bf16 %v626_v51, %v625_v50  ;;  %v595_v61 = vld [vmem:[%s4330_s3 + $0xd0] sm:$0xff] }
   0xe   :  { %2356 = vmatprep.subr.bf16.mxu0 %v2355_v39  ;;  %v609_v58 = vld [vmem:[%s4330_s3 + $0x140] sm:$0xff]  ;;  %v610_v60 = vld [vmem:[%s4330_s3 + $0x148] sm:$0xff]  ;;  %v596_v62 = vld [vmem:[%s4330_s3 + $0xd8] sm:$0xff]  ;;  %v2361_v2 = vpack.c.bf16 %v578_v57, %v577_v56 }
   0xf   :  { %2386 = vmatpush3.bf16.msra.mxu1 %v2385_v38  ;;  %v627_v0 = vld [vmem:[%s4330_s3 + $0x1d0] sm:$0xff]  ;;  %v628_v1 = vld [vmem:[%s4330_s3 + $0x1d8] sm:$0xff]  ;;  %v2393_v4 = vpack.c.bf16 %v610_v60, %v609_v58  ;;  %v2363_v5 = vpack.c.bf16 %v596_v62, %v595_v61  ;;  %v597_v11 = vld [vmem:[%s4330_s3 + $0xe0] sm:$0xff]  ;;  %v3059_v60 = vsub.s32 7, %v2933_v63 }
  0x10   :  { %2388 = vmatprep.subr.bf16.mxu1 %v2387_v43  ;;  %v579_v6 = vld [vmem:[%s4330_s3 + $0x50] sm:$0xff]  ;;  %v580_v7 = vld [vmem:[%s4330_s3 + $0x58] sm:$0xff]  ;;  %v2395_v9 = vpack.c.bf16 %v628_v1, %v627_v0  ;;  %v598_v12 = vld [vmem:[%s4330_s3 + $0xe8] sm:$0xff] }
  0x11   :  { %2358 = vmatpush3.bf16.msra.mxu0 %v2357_v49  ;;  %v611_v8 = vld [vmem:[%s4330_s3 + $0x150] sm:$0xff]  ;;  %v612_v10 = vld [vmem:[%s4330_s3 + $0x158] sm:$0xff]  ;;  %v629_v16 = vld [vmem:[%s4330_s3 + $0x1e0] sm:$0xff]  ;;  %v2365_v19 = vpack.c.bf16 %v580_v7, %v579_v6  ;;  %v2367_v24 = vpack.c.bf16 %v598_v12, %v597_v11 }
  0x12   :  { %2360 = vmatprep.subr.bf16.mxu0 %v2359_v55  ;;  %v630_v17 = vld [vmem:[%s4330_s3 + $0x1e8] sm:$0xff]  ;;  %v581_v20 = vld [vmem:[%s4330_s3 + $0x60] sm:$0xff]  ;;  %v2397_v23 = vpack.c.bf16 %v612_v10, %v611_v8  ;;  %v599_v31 = vld [vmem:[%s4330_s3 + $0xf0] sm:$0xff] }
  0x13   :  { %2390 = vmatpush3.bf16.msra.mxu1 %v2389_v54  ;;  %v582_v21 = vld [vmem:[%s4330_s3 + $0x68] sm:$0xff]  ;;  %v613_v25 = vld [vmem:[%s4330_s3 + $0x160] sm:$0xff]  ;;  %v2399_v30 = vpack.c.bf16 %v630_v17, %v629_v16  ;;  %v600_v32 = vld [vmem:[%s4330_s3 + $0xf8] sm:$0xff] }
  0x14   :  { %2392 = vmatprep.subr.bf16.mxu1 %v2391_v59  ;;  %v614_v26 = vld [vmem:[%s4330_s3 + $0x168] sm:$0xff]  ;;  %v2995_v27 = vld [vmem:[%s4328_s1] sm:$0xff]  ;;  %v631_v37 = vld [vmem:[%s4330_s3 + $0x1f0] sm:$0xff]  ;;  %v2369_v43 = vpack.c.bf16 %v582_v21, %v581_v20  ;;  %v2371_v47 = vpack.c.bf16 %v600_v32, %v599_v31 }
  0x15   :  { %2362 = vmatpush3.bf16.msra.mxu0 %v2361_v2  ;;  %v36_v33 = vrot.slane %v2995_v27, %v2960_v13  ;;  %v40_v34 = vrot.slane %v2995_v27, %v2963_v14  ;;  %v44_v35 = vrot.slane %v2995_v27, %v2966_v15  ;;  %v3018_v36 = vld [vmem:[%s4329_s2] sm:$0xff]  ;;  %v632_v38 = vld [vmem:[%s4330_s3 + $0x1f8] sm:$0xff]  ;;  %v48_v39 = vrot.slane %v2995_v27, %v2975_v18  ;;  %v583_v48 = vld [vmem:[%s4330_s3 + $0x70] sm:$0xff] }
  0x16   :  { %2364 = vmatprep.subr.bf16.mxu0 %v2363_v5  ;;  %v247_v40 = vrot.slane %v3018_v36, %v2960_v13  ;;  %v251_v41 = vrot.slane %v3018_v36, %v2963_v14  ;;  %v255_v42 = vrot.slane %v3018_v36, %v2966_v15  ;;  %v2401_v44 = vpack.c.bf16 %v614_v26, %v613_v25  ;;  %v584_v49 = vld [vmem:[%s4330_s3 + $0x78] sm:$0xff]  ;;  %v615_v50 = vld [vmem:[%s4330_s3 + $0x170] sm:$0xff]  ;;  %v649_v58 = vld [vmem:[%s4330_s3 + $0x280] sm:$0xff] }
  0x17   :  { %2394 = vmatpush3.bf16.msra.mxu1 %v2393_v4  ;;  %v125_v45 = vcombine.low %v36_v33, %v40_v34  ;;  %v259_v46 = vrot.slane %v3018_v36, %v2975_v18  ;;  %v126_v51 = vcombine.low %v44_v35, %v48_v39  ;;  %v2403_v54 = vpack.c.bf16 %v632_v38, %v631_v37  ;;  %v616_v55 = vld [vmem:[%s4330_s3 + $0x178] sm:$0xff]  ;;  %v650_v59 = vld [vmem:[%s4330_s3 + $0x288] sm:$0xff]  ;;  %v681_v0 = vld [vmem:[%s4330_s3 + $0x380] sm:$0xff] }
  0x18   :  { %2396 = vmatprep.subr.bf16.mxu1 %v2395_v9  ;;  %v336_v52 = vcombine.low %v247_v40, %v251_v41  ;;  %v682_v1 = vld [vmem:[%s4330_s3 + $0x388] sm:$0xff]  ;;  %v2373_v2 = vpack.c.bf16 %v584_v49, %v583_v48  ;;  %v21_v3 = vld [vmem:[%s4327_s0] sm:$0xff]  ;;  %v52_v4 = vrot.slane %v2995_v27, %v2998_v28  ;;  %v56_v5 = vrot.slane %v2995_v27, %v3001_v29 }
  0x19   :  { %2366 = vmatpush3.bf16.msra.mxu0 %v2365_v19  ;;  %v133_v56 = vrot.slane %v125_v45, %v2984_v22  ;;  %v337_v57 = vcombine.low %v255_v42, %v259_v46  ;;  %v140_v61 = vrot.slane %v126_v51, %v2984_v22  ;;  %v2405_v6 = vpack.c.bf16 %v616_v55, %v615_v50  ;;  %v22_v40 = vld [vmem:[%s4327_s0 + $0x8] sm:$0xff] }
  0x1a   :  { %2368 = vmatprep.subr.bf16.mxu0 %v2367_v24  ;;  %v344_v62 = vrot.slane %v336_v52, %v2984_v22  ;;  %v2407_v8 = vpack.c.bf16 %v650_v59, %v649_v58  ;;  %v2439_v10 = vpack.c.bf16 %v682_v1, %v681_v0  ;;  %v60_v11 = vrot.slane %v2995_v27, %v3046_v53  ;;  %v3111_v58 = vld [vmem:[%s4329_s2 + $0x8] sm:$0xff] }
  0x1b   :  { %2398 = vmatpush3.bf16.msra.mxu1 %v2397_v23  ;;  %v351_v63 = vrot.slane %v337_v57, %v2984_v22  ;;  %v141_v7 = vcombine.low %v133_v56, %v140_v61  ;;  %v64_v12 = vrot.slane %v2995_v27, %v3059_v60  ;;  %v142_v17 = vcombine.low %v52_v4, %v56_v5  ;;  %v28_v57 = vld [vmem:[%s4328_s1 + $0x8] sm:$0xff] }
  0x1c   :  { %2400 = vmatprep.subr.bf16.mxu1 %v2399_v30  ;;  %v263_v21 = vrot.slane %v3018_v36, %v2998_v28  ;;  %v267_v23 = vrot.slane %v3018_v36, %v3001_v29  ;;  %v271_v24 = vrot.slane %v3018_v36, %v3046_v53  ;;  %v275_v30 = vrot.slane %v3018_v36, %v3059_v60 }
  0x1d   :  { %2370 = vmatpush3.bf16.msra.mxu0 %v2369_v43  ;;  %v352_v9 = vcombine.low %v344_v62, %v351_v63  ;;  %v232_v16 = vmul.f32 %v141_v7, %v21_v3  ;;  %v143_v19 = vcombine.low %v60_v11, %v64_v12  ;;  %v150_v26 = vrot.slane %v142_v17, %v2984_v22 }
  0x1e   :  { %2372 = vmatprep.subr.bf16.mxu0 %v2371_v47  ;;  %v353_v32 = vcombine.low %v263_v21, %v267_v23  ;;  %v354_v33 = vcombine.low %v271_v24, %v275_v30  ;;  %v68_v61 = vrot.slane %v28_v57, %v2960_v13  ;;  %v72_v62 = vrot.slane %v28_v57, %v2963_v14  ;;  %v23_v23 = vld [vmem:[%s4327_s0 + $0x10] sm:$0xff] }
  0x1f   :  { %2402 = vmatpush3.bf16.msra.mxu1 %v2401_v44  ;;  %v3081_v20 = vadd.f32 %v352_v9, %v232_v16  ;;  %v157_v27 = vrot.slane %v143_v19, %v2984_v22  ;;  %v76_v0 = vrot.slane %v28_v57, %v2966_v15  ;;  %v80_v3 = vrot.slane %v28_v57, %v2975_v18 }
  0x20   :  { %2404 = vmatprep.subr.bf16.mxu1 %v2403_v54  ;;  %v361_v35 = vrot.slane %v353_v32, %v2984_v22  ;;  %v368_v38 = vrot.slane %v354_v33, %v2984_v22  ;;  %v159_v63 = vcombine.low %v68_v61, %v72_v62  ;;  %v279_v4 = vrot.slane %v3111_v58, %v2960_v13 }
  0x21   :  { %2374 = vmatpush3.bf16.msra.mxu0 %v2373_v2  ;;  %v467_v25 = vand.u32 2147483647, %v3081_v20  ;;  %v158_v37 = vcombine.low %v150_v26, %v157_v27  ;;  %v449_v52 = vmax.f32 %v3081_v20, 0.0  ;;  %vm455_vm1 = vcmp.ne.f32.partialorder %v3081_v20, %v3081_v20 }
  0x22   :  { %2408 = vmatprep.subr.bf16.mxu0 %v2407_v8  ;;  %v369_v39 = vcombine.low %v361_v35, %v368_v38  ;;  %v283_v5 = vrot.slane %v3111_v58, %v2963_v14  ;;  %v287_v7 = vrot.slane %v3111_v58, %v2966_v15  ;;  %v291_v8 = vrot.slane %v3111_v58, %v2975_v18 }
  0x23   :  { %2406 = vmatpush3.bf16.msra.mxu1 %v2405_v6  ;;  %v473_v31 = vsub.f32 0.0, %v467_v25  ;;  %v233_v41 = vmul.f32 %v158_v37, %v22_v40  ;;  %v160_v9 = vcombine.low %v76_v0, %v80_v3  ;;  %v84_v33 = vrot.slane %v28_v57, %v2998_v28  ;;  %v684_v3 = vld [vmem:[%s4330_s3 + $0x398] sm:$0xff] }
  0x24   :  { %2440 = vmatprep.subr.bf16.mxu1 %v2439_v10  ;;  %v167_v10 = vrot.slane %v159_v63, %v2984_v22  ;;  %v370_v11 = vcombine.low %v279_v4, %v283_v5  ;;  %v371_v12 = vcombine.low %v287_v7, %v291_v8  ;;  %v92_v38 = vrot.slane %v28_v57, %v3046_v53  ;;  %v635_v5 = vld [vmem:[%s4330_s3 + $0x210] sm:$0xff] }
  0x25   :  { %v479_v34 = vmul.f32 1.442695, %v473_v31  ;;  %v3099_v42 = vadd.f32 %v369_v39, %v233_v41  ;;  %v174_v17 = vrot.slane %v160_v9, %v2984_v22  ;;  %v96_v39 = vrot.slane %v28_v57, %v3059_v60 }
  0x26   :  { %v378_v19 = vrot.slane %v370_v11, %v2984_v22  ;;  %v385_v24 = vrot.slane %v371_v12, %v2984_v22  ;;  %v299_v61 = vrot.slane %v3111_v58, %v3001_v29  ;;  %v654_v11 = vld [vmem:[%s4330_s3 + $0x2a8] sm:$0xff]  ;;  %v303_v12 = vrot.slane %v3111_v58, %v3046_v53 }
  0x27   :  { %2712 = vpow2.f32 %v479_v34  ;;  %v468_v36 = vand.u32 2147483647, %v3099_v42  ;;  %v175_v25 = vcombine.low %v167_v10, %v174_v17  ;;  %v450_v32 = vmax.f32 %v3099_v42, 0.0  ;;  %v653_v10 = vld [vmem:[%s4330_s3 + $0x2a0] sm:$0xff] }
  0x28   :  { %v386_v26 = vcombine.low %v378_v19, %v385_v24  ;;  %v88_v34 = vrot.slane %v28_v57, %v3001_v29  ;;  %vm456_vm3 = vcmp.ne.f32.partialorder %v3099_v42, %v3099_v42  ;;  %v667_v19 = vld [vmem:[%s4330_s3 + $0x310] sm:$0xff] }
  0x29   :  { %v474_v43 = vsub.f32 0.0, %v468_v36  ;;  %v234_v30 = vmul.f32 %v175_v25, %v23_v23  ;;  %v24_v23 = vld [vmem:[%s4327_s0 + $0x18] sm:$0xff] }
  0x2b   :  { %v481_v46 = vmul.f32 1.442695, %v474_v43  ;;  %v3136_v37 = vadd.f32 %v386_v26, %v234_v30  ;;  %v2415_v30 = vpack.c.bf16 %v654_v11, %v653_v10  ;;  %v660_v10 = vld [vmem:[%s4330_s3 + $0x2d8] sm:$0xff] }
  0x2d   :  { %v469_v36 = vand.u32 2147483647, %v3136_v37  ;;  %vm457_vm5 = vcmp.ne.f32.partialorder %v3136_v37, %v3136_v37 }
  0x31   :  { %v2713_v44 = vpop.eup %2712 }
  0x32   :  { %v491_v45 = vadd.f32 1.0, %v2713_v44  ;;  %v494_v47 = vmul.f32 -0.5, %v2713_v44  ;;  %v497_v49 = vand.u32 2147483647, %v2713_v44 }
  0x34   :  { %2714 = vlog2.f32 %v491_v45  ;;  %v495_v48 = vadd.f32 1.0, %v494_v47  ;;  %vm498_vm0 = vcmp.lt.f32.partialorder %v497_v49, 0.0004427343  ;;  %v176_v45 = vcombine.low %v84_v33, %v88_v34  ;;  %v634_v47 = vld [vmem:[%s4330_s3 + $0x208] sm:$0xff] }
  0x35   :  { %2716 = vpow2.f32 %v481_v46  ;;  %v633_v46 = vld [vmem:[%s4330_s3 + $0x200] sm:$0xff]  ;;  %v177_v49 = vcombine.low %v92_v38, %v96_v39  ;;  %v656_v38 = vld [vmem:[%s4330_s3 + $0x2b8] sm:$0xff] }
  0x36   :  { %v496_v50 = vmul.f32 %v2713_v44, %v495_v48  ;;  %v475_v48 = vsub.f32 0.0, %v469_v36  ;;  %v2409_v0 = vpack.c.bf16 %v634_v47, %v633_v46  ;;  %v184_v63 = vrot.slane %v176_v45, %v2984_v22  ;;  %v669_v36 = vld [vmem:[%s4330_s3 + $0x320] sm:$0xff]  ;;  %v687_v45 = vld [vmem:[%s4330_s3 + $0x3b0] sm:$0xff]  ;;  %v688_v46 = vld [vmem:[%s4330_s3 + $0x3b8] sm:$0xff] }
  0x37   :  { %v191_v7 = vrot.slane %v177_v49, %v2984_v22 }
  0x38   :  { %v483_v57 = vmul.f32 1.442695, %v475_v48 }
  0x39   :  { %v192_v24 = vcombine.low %v184_v63, %v191_v7 }
  0x3b   :  { %v235_v39 = vmul.f32 %v192_v24, %v24_v23 }
  0x3e   :  { %v2715_v51 = vpop.eup %2714 }
  0x3f   :  { %v2717_v54 = vpop.eup %2716  ;;  %v493_v55 = vmul.f32 0.6931472, %v2715_v51 }
  0x40   :  { %v500_v56 = vadd.f32 1.0, %v2717_v54  ;;  %v503_v2 = vmul.f32 -0.5, %v2717_v54  ;;  %v506_v21 = vand.u32 2147483647, %v2717_v54 }
  0x41   :  { %v499_v59 = vsel %vm498_vm0, %v496_v50, %v493_v55  ;;  %v665_v55 = vld [vmem:[%s4330_s3 + $0x300] sm:$0xff] }
  0x42   :  { %v545_v1 = vadd.f32 %v499_v59, %v449_v52  ;;  %2718 = vlog2.f32 %v500_v56  ;;  %v504_v16 = vadd.f32 1.0, %v503_v2  ;;  %vm507_vm2 = vcmp.lt.f32.partialorder %v506_v21, 0.0004427343  ;;  %v651_v52 = vld [vmem:[%s4330_s3 + $0x290] sm:$0xff]  ;;  %v666_v56 = vld [vmem:[%s4330_s3 + $0x308] sm:$0xff]  ;;  %v668_v21 = vld [vmem:[%s4330_s3 + $0x318] sm:$0xff] }
  0x43   :  { %v295_v59 = vrot.slane %v3111_v58, %v2998_v28  ;;  %v683_v2 = vld [vmem:[%s4330_s3 + $0x390] sm:$0xff]  ;;  %v2441_v9 = vpack.c.bf16 %v666_v56, %v665_v55  ;;  %v2445_v34 = vpack.c.bf16 %v668_v21, %v667_v19  ;;  %v674_v19 = vld [vmem:[%s4330_s3 + $0x348] sm:$0xff] }
  0x44   :  { %v551_v6 = vsel %vm455_vm1, %v3081_v20, %v545_v1  ;;  %v505_v27 = vmul.f32 %v2717_v54, %v504_v16  ;;  %v307_v16 = vrot.slane %v3111_v58, %v3059_v60  ;;  %v2443_v17 = vpack.c.bf16 %v684_v3, %v683_v2  ;;  %v685_v60 = vld [vmem:[%s4330_s3 + $0x3a0] sm:$0xff]  ;;  %v686_v58 = vld [vmem:[%s4330_s3 + $0x3a8] sm:$0xff] }
  0x45   :  { %2720 = vtanh.f32 %v551_v6  ;;  %v636_v6 = vld [vmem:[%s4330_s3 + $0x218] sm:$0xff]  ;;  %v387_v25 = vcombine.low %v295_v59, %v299_v61  ;;  %v2451_v59 = vpack.c.bf16 %v688_v46, %v687_v45  ;;  %v671_v61 = vld [vmem:[%s4330_s3 + $0x330] sm:$0xff]  ;;  %v694_v45 = vld [vmem:[%s4330_s3 + $0x3e8] sm:$0xff] }
  0x46   :  { %v2413_v26 = vpack.c.bf16 %v636_v6, %v635_v5  ;;  %v641_v5 = vld [vmem:[%s4330_s3 + $0x240] sm:$0xff]  ;;  %v642_v6 = vld [vmem:[%s4330_s3 + $0x248] sm:$0xff] }
  0x47   :  { %v395_v33 = vrot.slane %v387_v25, %v2984_v22  ;;  %v2425_v24 = vpack.c.bf16 %v642_v6, %v641_v5  ;;  %v691_v25 = vld [vmem:[%s4330_s3 + $0x3d0] sm:$0xff]  ;;  %v677_v46 = vld [vmem:[%s4330_s3 + $0x360] sm:$0xff] }
  0x4c   :  { %v2719_v31 = vpop.eup %2718 }
  0x4d   :  { %v502_v35 = vmul.f32 0.6931472, %v2719_v31  ;;  %v637_v31 = vld [vmem:[%s4330_s3 + $0x220] sm:$0xff] }
  0x4f   :  { %v2721_v40 = vpop.eup %2720  ;;  %v508_v41 = vsel %vm507_vm2, %v505_v27, %v502_v35  ;;  %v388_v27 = vcombine.low %v303_v12, %v307_v16  ;;  %v655_v35 = vld [vmem:[%s4330_s3 + $0x2b0] sm:$0xff] }
  0x50   :  { %v563_v43 = vmul.f32 %v2721_v40, %v3081_v20  ;;  %v546_v44 = vadd.f32 %v508_v41, %v450_v32  ;;  %v652_v20 = vld [vmem:[%s4330_s3 + $0x298] sm:$0xff]  ;;  %v638_v32 = vld [vmem:[%s4330_s3 + $0x228] sm:$0xff]  ;;  %v2447_v41 = vpack.c.bf16 %v686_v58, %v685_v60  ;;  %v2419_v49 = vpack.c.bf16 %v656_v38, %v655_v35  ;;  %v661_v35 = vld [vmem:[%s4330_s3 + $0x2e0] sm:$0xff] }
  0x51   :  { %v2411_v4 = vpack.c.bf16 %v652_v20, %v651_v52  ;;  %v402_v40 = vrot.slane %v388_v27, %v2984_v22  ;;  %v657_v20 = vld [vmem:[%s4330_s3 + $0x2c0] sm:$0xff]  ;;  %v643_v27 = vld [vmem:[%s4330_s3 + $0x250] sm:$0xff]  ;;  %v662_v38 = vld [vmem:[%s4330_s3 + $0x2e8] sm:$0xff] }
  0x52   :  { %v950_v50 = vrot.slane %v563_v43, %v2984_v22  ;;  %v943_v51 = vcombine.high %v563_v43, %v563_v43  ;;  %v552_v54 = vsel %vm456_vm3, %v3099_v42, %v546_v44  ;;  %v670_v43 = vld [vmem:[%s4330_s3 + $0x328] sm:$0xff]  ;;  %v2417_v44 = vpack.c.bf16 %v638_v32, %v637_v31  ;;  %v675_v31 = vld [vmem:[%s4330_s3 + $0x350] sm:$0xff] }
  0x53   :  { %2722 = vtanh.f32 %v552_v54  ;;  %v403_v47 = vcombine.low %v395_v33, %v402_v40  ;;  %v2449_v52 = vpack.c.bf16 %v670_v43, %v669_v36  ;;  %v658_v54 = vld [vmem:[%s4330_s3 + $0x2c8] sm:$0xff]  ;;  %v645_v40 = vld [vmem:[%s4330_s3 + $0x260] sm:$0xff] }
  0x54   :  { %v958_v62 = vcombine.high %v950_v50, %v950_v50  ;;  %v957_v1 = vrot.slane %v943_v51, %v2984_v22  ;;  %2724 = vpow2.f32 %v483_v57  ;;  %v640_v51 = vld [vmem:[%s4330_s3 + $0x238] sm:$0xff]  ;;  %v693_v36 = vld [vmem:[%s4330_s3 + $0x3e0] sm:$0xff] }
  0x55   :  { %v3247_v56 = vadd.f32 %v403_v47, %v235_v39  ;;  %v678_v47 = vld [vmem:[%s4330_s3 + $0x368] sm:$0xff] }
  0x56   :  { %1133 = vmatprep.mubr.f32.mxu0 %v958_v62  ;;  %v959_v8 = vcombine.high %v957_v1, %v957_v1  ;;  %v672_v62 = vld [vmem:[%s4330_s3 + $0x338] sm:$0xff] }
  0x57   :  { %1134 = vmatmul.mubr.f32.vlgmr.msra.gmra.mrb[0].mxu0 %v950_v50  ;;  %v639_v50 = vld [vmem:[%s4330_s3 + $0x230] sm:$0xff]  ;;  %v470_v7 = vand.u32 2147483647, %v3247_v56 }
  0x58   :  { %2410 = vmatpush3.bf16.msra.mxu0 %v2409_v0  ;;  %1203 = vmatprep.mubr.f32.mxu1 %v959_v8  ;;  %v2421_v0 = vpack.c.bf16 %v640_v51, %v639_v50  ;;  %v2453_v8 = vpack.c.bf16 %v672_v62, %v671_v61  ;;  %v663_v50 = vld [vmem:[%s4330_s3 + $0x2f0] sm:$0xff]  ;;  %v664_v51 = vld [vmem:[%s4330_s3 + $0x2f8] sm:$0xff]  ;;  %v2463_v62 = vpack.c.bf16 %v694_v45, %v693_v36 }
  0x59   :  { %1204 = vmatmul.mubr.f32.vlgmr.msra.gmra.mrb[0].mxu1 %v957_v1  ;;  %2412 = vmatprep.subr.bf16.mxu0 %v2411_v4  ;;  %v690_v1 = vld [vmem:[%s4330_s3 + $0x3c8] sm:$0xff]  ;;  %v2423_v4 = vpack.c.bf16 %v658_v54, %v657_v20  ;;  %v476_v23 = vsub.f32 0.0, %v470_v7  ;;  %v3351_v54 = vld [vmem:[%s4330_s3 + $0x278] sm:$0xff]  ;;  %v747_v45 = vld [vmem:[%s4330_s3 + $0x590] sm:$0xff] }
  0x5a   :  { %2442 = vmatpush3.bf16.msra.mxu1 %v2441_v9  ;;  %v659_v9 = vld [vmem:[%s4330_s3 + $0x2d0] sm:$0xff] }
  0x5b   :  { %2444 = vmatprep.subr.bf16.mxu1 %v2443_v17  ;;  %v673_v17 = vld [vmem:[%s4330_s3 + $0x340] sm:$0xff]  ;;  %v2427_v58 = vpack.c.bf16 %v660_v10, %v659_v9  ;;  %v485_v32 = vmul.f32 1.442695, %v476_v23  ;;  %v3382_v9 = vld [vmem:[%s4330_s3 + $0x370] sm:$0xff]  ;;  %v680_v23 = vld [vmem:[%s4330_s3 + $0x378] sm:$0xff] }
  0x5c   :  { %2414 = vmatpush3.bf16.msra.mxu0 %v2413_v26  ;;  %v692_v26 = vld [vmem:[%s4330_s3 + $0x3d8] sm:$0xff]  ;;  %v2457_v33 = vpack.c.bf16 %v674_v19, %v673_v17  ;;  %v713_v10 = vld [vmem:[%s4330_s3 + $0x480] sm:$0xff]  ;;  %v2469_v36 = vpack.c.bf16 %v680_v23, %v3382_v9 }
  0x5d   :  { %v2723_v48 = vpop.eup %2722  ;;  %2416 = vmatprep.subr.bf16.mxu0 %v2415_v30  ;;  %v644_v30 = vld [vmem:[%s4330_s3 + $0x258] sm:$0xff]  ;;  %v2459_v39 = vpack.c.bf16 %v692_v26, %v691_v25  ;;  %v746_v25 = vld [vmem:[%s4330_s3 + $0x588] sm:$0xff] }
  0x5e   :  { %2446 = vmatpush3.bf16.msra.mxu1 %v2445_v34  ;;  %v564_v55 = vmul.f32 %v2723_v48, %v3099_v42  ;;  %v3249_v57 = vpop.eup %2724  ;;  %v689_v42 = vld [vmem:[%s4330_s3 + $0x3c0] sm:$0xff]  ;;  %v676_v34 = vld [vmem:[%s4330_s3 + $0x358] sm:$0xff] }
  0x5f   :  { %2448 = vmatprep.subr.bf16.mxu1 %v2447_v41  ;;  %v509_v63 = vadd.f32 1.0, %v3249_v57  ;;  %v2455_v16 = vpack.c.bf16 %v690_v1, %v689_v42  ;;  %v512_v21 = vmul.f32 -0.5, %v3249_v57  ;;  %v646_v41 = vld [vmem:[%s4330_s3 + $0x268] sm:$0xff]  ;;  %v515_v48 = vand.u32 2147483647, %v3249_v57  ;;  %v3540_v23 = vld [vmem:[%s4330_s3 + $0x438] sm:$0xff] }
  0x60   :  { %2418 = vmatpush3.bf16.msra.mxu0 %v2417_v44  ;;  %v3264_v2 = vrot.slane %v564_v55, %v2984_v22  ;;  %v960_v3 = vcombine.high %v564_v55, %v564_v55  ;;  %v2429_v44 = vpack.c.bf16 %v644_v30, %v643_v27  ;;  %v2461_v20 = vpack.c.bf16 %v676_v34, %v675_v31  ;;  %v695_v55 = vld [vmem:[%s4330_s3 + $0x3f0] sm:$0xff]  ;;  %v697_v30 = vld [vmem:[%s4330_s3 + $0x400] sm:$0xff]  ;;  %v698_v31 = vld [vmem:[%s4330_s3 + $0x408] sm:$0xff] }
  0x61   :  { %2420 = vmatprep.subr.bf16.mxu0 %v2419_v49  ;;  %2726 = vlog2.f32 %v509_v63  ;;  %v513_v43 = vadd.f32 1.0, %v512_v21  ;;  %v2431_v49 = vpack.c.bf16 %v662_v38, %v661_v35  ;;  %v2433_v61 = vpack.c.bf16 %v646_v41, %v645_v40  ;;  %v3433_v38 = vld [vmem:[%s4330_s3 + $0x508] sm:$0xff]  ;;  %v3444_v40 = vld [vmem:[%s4330_s3 + $0x410] sm:$0xff] }
  0x62   :  { %2450 = vmatpush3.bf16.msra.mxu1 %v2449_v52  ;;  %v975_v11 = vcombine.high %v3264_v2, %v3264_v2  ;;  %v3283_v12 = vrot.slane %v960_v3, %v2984_v22  ;;  %2728 = vpow2.f32 %v485_v32  ;;  %v3346_v52 = vld [vmem:[%s4330_s3 + $0x270] sm:$0xff]  ;;  %v2465_v1 = vpack.c.bf16 %v678_v47, %v677_v46  ;;  %v748_v46 = vld [vmem:[%s4330_s3 + $0x598] sm:$0xff] }
  0x63   :  { %2452 = vmatprep.subr.bf16.mxu1 %v2451_v59  ;;  %v696_v59 = vld [vmem:[%s4330_s3 + $0x3f8] sm:$0xff]  ;;  %v2435_v3 = vpack.c.bf16 %v664_v51, %v663_v50  ;;  %v451_v63 = vmax.f32 %v3136_v37, 0.0  ;;  %vm3361_vm4 = vcmp.lt.f32.partialorder %v515_v48, 0.0004427343  ;;  %v2437_v5 = vpack.c.bf16 %v3351_v54, %v3346_v52  ;;  %v3476_v51 = vld [vmem:[%s4330_s3 + $0x4a0] sm:$0xff]  ;;  %v3481_v52 = vld [vmem:[%s4330_s3 + $0x4a8] sm:$0xff] }
  0x64   :  { %2422 = vmatpush3.bf16.msra.mxu0 %v2421_v0  ;;  %1273 = vmatprep.mubr.f32.mxu0 %v975_v11  ;;  %v976_v60 = vcombine.high %v3283_v12, %v3283_v12  ;;  %v514_v0 = vmul.f32 %v3249_v57, %v513_v43  ;;  %v2467_v6 = vpack.c.bf16 %v696_v59, %v695_v55  ;;  %v3372_v57 = vld [vmem:[%s4328_s1 + $0x10] sm:$0x7f]  ;;  %v714_v11 = vld [vmem:[%s4330_s3 + $0x488] sm:$0xff]  ;;  %v3471_v50 = vld [vmem:[%s4330_s3 + $0x518] sm:$0xff] }
  0x65   :  { %2424 = vmatprep.subr.bf16.mxu0 %v2423_v4  ;;  %v104_v17 = vrot.slane %v3372_v57, %v2963_v14  ;;  %v108_v19 = vrot.slane %v3372_v57, %v2966_v15  ;;  %v112_v21 = vrot.slane %v3372_v57, %v2975_v18  ;;  %v2473_v59 = vpack.c.bf16 %v698_v31, %v697_v30  ;;  %v750_v4 = vld [vmem:[%s4330_s3 + $0x5a8] sm:$0xff]  ;;  %v3561_v30 = vld [vmem:[%s4330_s3 + $0x530] sm:$0xff]  ;;  %v3566_v31 = vld [vmem:[%s4330_s3 + $0x538] sm:$0xff] }
  0x66   :  { %2454 = vmatpush3.bf16.msra.mxu1 %v2453_v8  ;;  %1343 = vmatprep.mubr.f32.mxu1 %v976_v60  ;;  %v3377_v8 = vld [vmem:[%s4329_s2 + $0x10] sm:$0x7f] }
  0x67   :  { %2456 = vmatprep.subr.bf16.mxu1 %v2455_v16  ;;  %v100_v16 = vrot.slane %v3372_v57, %v2960_v13  ;;  %v311_v60 = vrot.slane %v3377_v8, %v2960_v13  ;;  %v319_v27 = vrot.slane %v3377_v8, %v2966_v15  ;;  %v194_v34 = vcombine.low %v108_v19, %v112_v21  ;;  %v3428_v15 = vld [vmem:[%s4330_s3 + $0x500] sm:$0xff]  ;;  %v3535_v21 = vld [vmem:[%s4330_s3 + $0x430] sm:$0xff] }
  0x68   :  { %2426 = vmatpush3.bf16.msra.mxu0 %v2425_v24  ;;  %v745_v24 = vld [vmem:[%s4330_s3 + $0x580] sm:$0xff]  ;;  %v323_v13 = vrot.slane %v3377_v8, %v2975_v18  ;;  %v716_v18 = vld [vmem:[%s4330_s3 + $0x498] sm:$0xff]  ;;  %v2505_v9 = vpack.c.bf16 %v3433_v38, %v3428_v15  ;;  %v2507_v19 = vpack.c.bf16 %v748_v46, %v747_v45  ;;  %v116_v38 = vrot.slane %v3372_v57, %v2998_v28 }
  0x69   :  { %2428 = vmatprep.subr.bf16.mxu0 %v2427_v58  ;;  %v315_v58 = vrot.slane %v3377_v8, %v2963_v14  ;;  %v2471_v14 = vpack.c.bf16 %v714_v11, %v713_v10  ;;  %v2503_v43 = vpack.c.bf16 %v746_v25, %v745_v24  ;;  %v208_v54 = vrot.slane %v194_v34, %v2984_v22  ;;  %v3519_v11 = vld [vmem:[%s4330_s3 + $0x528] sm:$0xff]  ;;  %v3545_v24 = vld [vmem:[%s4330_s3 + $0x5b0] sm:$0xff] }
  0x6a   :  { %2458 = vmatpush3.bf16.msra.mxu1 %v2457_v33  ;;  %v193_v33 = vcombine.low %v100_v16, %v104_v17  ;;  %v405_v55 = vcombine.low %v319_v27, %v323_v13  ;;  %v3524_v16 = vld [vmem:[%s4330_s3 + $0x4b0] sm:$0xff]  ;;  %v3529_v17 = vld [vmem:[%s4330_s3 + $0x4b8] sm:$0xff] }
  0x6b   :  { %2460 = vmatprep.subr.bf16.mxu1 %v2459_v39  ;;  %v2727_v42 = vpop.eup %2726  ;;  %v715_v39 = vld [vmem:[%s4330_s3 + $0x490] sm:$0xff]  ;;  %v404_v41 = vcombine.low %v311_v60, %v315_v58  ;;  %v2479_v60 = vpack.c.bf16 %v3481_v52, %v3476_v51  ;;  %v3556_v27 = vld [vmem:[%s4330_s3 + $0x5b8] sm:$0xff] }
  0x6c   :  { %2430 = vmatpush3.bf16.msra.mxu0 %v2429_v44  ;;  %v511_v7 = vmul.f32 0.6931472, %v2727_v42  ;;  %v3423_v35 = vpop.eup %2728  ;;  %v3450_v44 = vld [vmem:[%s4330_s3 + $0x418] sm:$0xff]  ;;  %v25_v42 = vld [vmem:[%s4327_s0 + $0x20] sm:$0xff] }
  0x6d   :  { %2432 = vmatprep.subr.bf16.mxu0 %v2431_v49  ;;  %v518_v48 = vadd.f32 1.0, %v3423_v35  ;;  %v3466_v49 = vld [vmem:[%s4330_s3 + $0x510] sm:$0xff]  ;;  %v2477_v10 = vpack.c.bf16 %v3450_v44, %v3444_v40  ;;  %v524_v15 = vand.u32 2147483647, %v3423_v35  ;;  %v2517_v40 = vpack.c.bf16 %v3566_v31, %v3561_v30 }
  0x6e   :  { %2462 = vmatpush3.bf16.msra.mxu1 %v2461_v20  ;;  %v517_v26 = vsel %vm3361_vm4, %v514_v0, %v511_v7  ;;  %v201_v20 = vrot.slane %v193_v33, %v2984_v22  ;;  %v521_v0 = vmul.f32 -0.5, %v3423_v35  ;;  %v419_v7 = vrot.slane %v405_v55, %v2984_v22 }
  0x6f   :  { %2464 = vmatprep.subr.bf16.mxu1 %v2463_v62  ;;  %v547_v32 = vadd.f32 %v517_v26, %v451_v63  ;;  %v3493_v62 = vld [vmem:[%s4330_s3 + $0x428] sm:$0xff]  ;;  %v749_v63 = vld [vmem:[%s4330_s3 + $0x5a0] sm:$0xff]  ;;  %v124_v44 = vrot.slane %v3372_v57, %v3046_v53 }
  0x70   :  { %2434 = vmatpush3.bf16.msra.mxu0 %v2433_v61  ;;  %v3488_v61 = vld [vmem:[%s4330_s3 + $0x420] sm:$0xff]  ;;  %v2511_v33 = vpack.c.bf16 %v750_v4, %v749_v63 }
  0x71   :  { %2436 = vmatprep.subr.bf16.mxu0 %v2435_v3  ;;  %v553_v47 = vsel %vm457_vm5, %v3136_v37, %v547_v32  ;;  %v2475_v3 = vpack.c.bf16 %v716_v18, %v715_v39  ;;  %v2481_v58 = vpack.c.bf16 %v3493_v62, %v3488_v61  ;;  %v522_v32 = vadd.f32 1.0, %v521_v0 }
  0x72   :  { %2466 = vmatpush3.bf16.msra.mxu1 %v2465_v1  ;;  %2730 = vtanh.f32 %v553_v47  ;;  %v412_v1 = vrot.slane %v404_v41, %v2984_v22  ;;  %v120_v39 = vrot.slane %v3372_v57, %v3001_v29  ;;  %v2515_v18 = vpack.c.bf16 %v3556_v27, %v3545_v24  ;;  %v721_v47 = vld [vmem:[%s4330_s3 + $0x4c0] sm:$0xff] }
  0x73   :  { %2468 = vmatprep.subr.bf16.mxu1 %v2467_v6  ;;  %2732 = vlog2.f32 %v518_v48  ;;  %v209_v6 = vcombine.low %v201_v20, %v208_v54  ;;  %v722_v48 = vld [vmem:[%s4330_s3 + $0x4c8] sm:$0xff]  ;;  %v335_v57 = vrot.slane %v3377_v8, %v3046_v53 }
  0x74   :  { %2438 = vmatpush3.bf16.msra.mxu0 %v2437_v5  ;;  %v3509_v5 = vld [vmem:[%s4330_s3 + $0x520] sm:$0xff]  ;;  %v420_v26 = vcombine.low %v412_v1, %v419_v7  ;;  %v210_v45 = vcombine.low %v116_v38, %v120_v39 }
  0x75   :  { %2472 = vmatprep.subr.bf16.mxu0 %v2471_v14  ;;  %v236_v25 = vmul.f32 %v209_v6, %v25_v42  ;;  %v2513_v34 = vpack.c.bf16 %v3519_v11, %v3509_v5  ;;  %v2483_v14 = vpack.c.bf16 %v3529_v17, %v3524_v16 }
  0x76   :  { %2470 = vmatpush3.bf16.msra.mxu1 %v2469_v36  ;;  %v452_v36 = vmax.f32 %v3247_v56, 0.0 }
  0x77   :  { %1274 = vmatmul.mubr.f32.vlgmr.msra.gmra.mrb[2].mxu0 %v3264_v2  ;;  %2504 = vmatprep.subr.bf16.mxu1 %v2503_v43  ;;  %v2509_v2 = vpack.c.bf16 %v3471_v50, %v3466_v49  ;;  %v3571_v13 = vadd.f32 %v420_v26, %v236_v25  ;;  %v523_v43 = vmul.f32 %v3423_v35, %v522_v32 }
  0x78   :  { %2474 = vmatpush3.bf16.msra.mxu0 %v2473_v59  ;;  %v327_v50 = vrot.slane %v3377_v8, %v2998_v28  ;;  %v331_v35 = vrot.slane %v3377_v8, %v3001_v29 }
  0x79   :  { %1344 = vmatmul.mubr.f32.vlgmr.msra.gmra.mrb[2].mxu1 %v3283_v12  ;;  %2476 = vmatprep.subr.bf16.mxu0 %v2475_v3  ;;  %v2485_v12 = vpack.c.bf16 %v3540_v23, %v3535_v21  ;;  %v471_v41 = vand.u32 2147483647, %v3571_v13 }
  0x7a   :  { %2506 = vmatpush3.bf16.msra.mxu1 %v2505_v9 }
  0x7b   :  { %2508 = vmatprep.subr.bf16.mxu1 %v2507_v19  ;;  %v477_v49 = vsub.f32 0.0, %v471_v41 }
  0x7c   :  { %2478 = vmatpush3.bf16.msra.mxu0 %v2477_v10  ;;  %v2731_v46 = vpop.eup %2730 }
  0x7d   :  { %2480 = vmatprep.subr.bf16.mxu0 %v2479_v60 }
  0x7e   :  { %10 = vsyncpa [#allocation3], 0  ;;  %v2733_v51 = vpop.eup %2732  ;;  %2510 = vmatpush3.bf16.msra.mxu1 %v2509_v2  ;;  %v565_v52 = vmul.f32 %v2731_v46, %v3136_v37  ;;  %vm3604_vm6 = vcmp.lt.f32.partialorder %v524_v15, 0.0004427343  ;;  %v217_v54 = vrot.slane %v210_v45, %v2984_v22  ;;  %v224_v55 = vrot.slane %v124_v44, %v2984_v22  ;;  %v26_v29 = vld [vmem:[%s4327_s0 + $0x28] sm:$0x3f] }
  0x7f   :  { %2512 = vmatprep.subr.bf16.mxu1 %v2511_v33  ;;  %v520_v28 = vmul.f32 0.6931472, %v2733_v51  ;;  %v487_v59 = vmul.f32 1.442695, %v477_v49  ;;  %v421_v53 = vcombine.low %v327_v50, %v331_v35  ;;  %v435_v8 = vrot.slane %v335_v57, %v2984_v22  ;;  %v753_v61 = vld [vmem:[%s4330_s3 + $0x5c0] sm:$0xff]  ;;  %v754_v62 = vld [vmem:[%s4330_s3 + $0x5c8] sm:$0xff] }
  0x80   :  { %2482 = vmatpush3.bf16.msra.mxu0 %v2481_v58  ;;  %v2487_v37 = vpack.c.bf16 %v722_v48, %v721_v47  ;;  %v3621_v0 = vrot.slane %v565_v52, %v2984_v22  ;;  %v977_v42 = vcombine.high %v565_v52, %v565_v52  ;;  %v225_v1 = vcombine.low %v217_v54, %v224_v55  ;;  %v705_v3 = vld [vmem:[%s4330_s3 + $0x440] sm:$0xff]  ;;  %v706_v63 = vld [vmem:[%s4330_s3 + $0x448] sm:$0xff]  ;;  %v723_v6 = vld [vmem:[%s4330_s3 + $0x4d0] sm:$0xff] }
  0x81   :  { %2484 = vmatprep.subr.bf16.mxu0 %v2483_v14  ;;  %vm458_vm7 = vcmp.ne.f32.partialorder %v3247_v56, %v3247_v56  ;;  %v526_v4 = vsel %vm3604_vm6, %v523_v43, %v520_v28  ;;  %2734 = vpow2.f32 %v487_v59  ;;  %v428_v5 = vrot.slane %v421_v53, %v2984_v22  ;;  %v724_v7 = vld [vmem:[%s4330_s3 + $0x4d8] sm:$0xff]  ;;  %v737_v19 = vld [vmem:[%s4330_s3 + $0x540] sm:$0xff]  ;;  %v738_v21 = vld [vmem:[%s4330_s3 + $0x548] sm:$0xff] }
  0x82   :  { %2514 = vmatpush3.bf16.msra.mxu1 %v2513_v34  ;;  %v992_v9 = vcombine.high %v3621_v0, %v3621_v0  ;;  %v3643_v10 = vrot.slane %v977_v42, %v2984_v22  ;;  %v548_v11 = vadd.f32 %v526_v4, %v452_v36  ;;  %v237_v16 = vmul.f32 %v225_v1, %v26_v29  ;;  %v755_v25 = vld [vmem:[%s4330_s3 + $0x5d0] sm:$0xff]  ;;  %v756_v26 = vld [vmem:[%s4330_s3 + $0x5d8] sm:$0xff]  ;;  %v725_v14 = vld [vmem:[%s4330_s3 + $0x4e0] sm:$0xff] }
  0x83   :  { %2516 = vmatprep.subr.bf16.mxu1 %v2515_v18  ;;  %v2519_v17 = vpack.c.bf16 %v754_v62, %v753_v61  ;;  %v436_v23 = vcombine.low %v428_v5, %v435_v8  ;;  %v2489_v24 = vpack.c.bf16 %v706_v63, %v705_v3  ;;  %v2491_v58 = vpack.c.bf16 %v724_v7, %v723_v6  ;;  %v707_v27 = vld [vmem:[%s4330_s3 + $0x450] sm:$0xff]  ;;  %v708_v32 = vld [vmem:[%s4330_s3 + $0x458] sm:$0xff]  ;;  %v726_v15 = vld [vmem:[%s4330_s3 + $0x4e8] sm:$0xff] }
  0x84   :  { %2486 = vmatpush3.bf16.msra.mxu0 %v2485_v12  ;;  %1413 = vmatprep.mubr.f32.mxu0 %v992_v9  ;;  %v993_v2 = vcombine.high %v3643_v10, %v3643_v10  ;;  %v554_v60 = vsel %vm458_vm7, %v3247_v56, %v548_v11  ;;  %v2521_v34 = vpack.c.bf16 %v738_v21, %v737_v19  ;;  %v739_v39 = vld [vmem:[%s4330_s3 + $0x550] sm:$0xff]  ;;  %v740_v30 = vld [vmem:[%s4330_s3 + $0x558] sm:$0xff]  ;;  %v757_v18 = vld [vmem:[%s4330_s3 + $0x5e0] sm:$0xff]  ;;  %vm2774_vm12 = vmmov 0  }
  0x85   :  { %2488 = vmatprep.subr.bf16.mxu0 %v2487_v37  ;;  %2736 = vtanh.f32 %v554_v60  ;;  %v3669_v33 = vadd.f32 %v436_v23, %v237_v16  ;;  %v2523_v38 = vpack.c.bf16 %v756_v26, %v755_v25  ;;  %v2493_v12 = vpack.c.bf16 %v708_v32, %v707_v27  ;;  %v709_v36 = vld [vmem:[%s4330_s3 + $0x460] sm:$0xff]  ;;  %v710_v43 = vld [vmem:[%s4330_s3 + $0x468] sm:$0xff]  ;;  %v727_v45 = vld [vmem:[%s4330_s3 + $0x4f0] sm:$0xff] }
  0x86   :  { %2518 = vmatpush3.bf16.msra.mxu1 %v2517_v40  ;;  %1483 = vmatprep.mubr.f32.mxu1 %v993_v2  ;;  %v758_v40 = vld [vmem:[%s4330_s3 + $0x5e8] sm:$0xff]  ;;  %v2495_v41 = vpack.c.bf16 %v726_v15, %v725_v14  ;;  %v2525_v44 = vpack.c.bf16 %v740_v30, %v739_v39  ;;  %v728_v46 = vld [vmem:[%s4330_s3 + $0x4f8] sm:$0xff]  ;;  %v741_v49 = vld [vmem:[%s4330_s3 + $0x560] sm:$0xff]  ;;  %v2497_v57 = vpack.c.bf16 %v710_v43, %v709_v36  ;;  %vm1066_vm13 = vcmask 588800  }
  0x87   :  { %2520 = vmatprep.subr.bf16.mxu1 %v2519_v17  ;;  %v472_v31 = vand.u32 2147483647, %v3669_v33  ;;  %v2527_v48 = vpack.c.bf16 %v758_v40, %v757_v18  ;;  %v742_v50 = vld [vmem:[%s4330_s3 + $0x568] sm:$0xff]  ;;  %v759_v51 = vld [vmem:[%s4330_s3 + $0x5f0] sm:$0xff]  ;;  %v760_v52 = vld [vmem:[%s4330_s3 + $0x5f8] sm:$0xff]  ;;  %v2499_v54 = vpack.c.bf16 %v728_v46, %v727_v45  ;;  %v453_v45 = vmax.f32 %v3571_v13, 0.0 }
  0x88   :  { %2490 = vmatpush3.bf16.msra.mxu0 %v2489_v24  ;;  %v711_v55 = vld [vmem:[%s4330_s3 + $0x470] sm:$0xff]  ;;  %v712_v28 = vld [vmem:[%s4330_s3 + $0x478] sm:$0xff]  ;;  %v2529_v59 = vpack.c.bf16 %v742_v50, %v741_v49  ;;  %v777_v29 = vld [vmem:[%s4330_s3 + $0x680] sm:$0xff]  ;;  %v2531_v37 = vpack.c.bf16 %v760_v52, %v759_v51  ;;  %vm459_vm9 = vcmp.ne.f32.partialorder %v3571_v13, %v3571_v13  ;;  %vm460_vm11 = vcmp.ne.f32.partialorder %v3669_v33, %v3669_v33 }
  0x89   :  { %2492 = vmatprep.subr.bf16.mxu0 %v2491_v58  ;;  %v478_v35 = vsub.f32 0.0, %v472_v31  ;;  %v778_v53 = vld [vmem:[%s4330_s3 + $0x688] sm:$0xff]  ;;  %v743_v61 = vld [vmem:[%s4330_s3 + $0x570] sm:$0xff]  ;;  %v744_v62 = vld [vmem:[%s4330_s3 + $0x578] sm:$0xff]  ;;  %v2501_v3 = vpack.c.bf16 %v712_v28, %v711_v55  ;;  %vm1909_vm14 = vcmask 17408  }
  0x8a   :  { %2522 = vmatpush3.bf16.msra.mxu1 %v2521_v34  ;;  %v809_v63 = vld [vmem:[%s4330_s3 + $0x780] sm:$0xff]  ;;  %v810_v4 = vld [vmem:[%s4330_s3 + $0x788] sm:$0xff]  ;;  %v2535_v6 = vpack.c.bf16 %v778_v53, %v777_v29  ;;  %v2533_v11 = vpack.c.bf16 %v744_v62, %v743_v61  ;;  %v779_v16 = vld [vmem:[%s4330_s3 + $0x690] sm:$0xff] }
  0x8b   :  { %v3705_v47 = vpop.eup %2734  ;;  %2524 = vmatprep.subr.bf16.mxu1 %v2523_v38  ;;  %v489_v1 = vmul.f32 1.442695, %v478_v35  ;;  %v761_v7 = vld [vmem:[%s4330_s3 + $0x600] sm:$0xff]  ;;  %v762_v9 = vld [vmem:[%s4330_s3 + $0x608] sm:$0xff]  ;;  %v2567_v21 = vpack.c.bf16 %v810_v4, %v809_v63  ;;  %v811_v2 = vld [vmem:[%s4330_s3 + $0x790] sm:$0xff] }
  0x8c   :  { %2494 = vmatpush3.bf16.msra.mxu0 %v2493_v12  ;;  %v527_v20 = vadd.f32 1.0, %v3705_v47  ;;  %v530_v42 = vmul.f32 -0.5, %v3705_v47  ;;  %v793_v23 = vld [vmem:[%s4330_s3 + $0x700] sm:$0xff]  ;;  %v794_v24 = vld [vmem:[%s4330_s3 + $0x708] sm:$0xff]  ;;  %v2537_v26 = vpack.c.bf16 %v762_v9, %v761_v7  ;;  %v812_v60 = vld [vmem:[%s4330_s3 + $0x798] sm:$0xff] }
  0x8d   :  { %2496 = vmatprep.subr.bf16.mxu0 %v2495_v41  ;;  %v533_v32 = vand.u32 2147483647, %v3705_v47  ;;  %v763_v14 = vld [vmem:[%s4330_s3 + $0x610] sm:$0xff]  ;;  %v764_v15 = vld [vmem:[%s4330_s3 + $0x618] sm:$0xff]  ;;  %v2569_v38 = vpack.c.bf16 %v794_v24, %v793_v23  ;;  %v781_v39 = vld [vmem:[%s4330_s3 + $0x6a0] sm:$0xff]  ;;  %v2571_v12 = vpack.c.bf16 %v812_v60, %v811_v2 }
  0x8e   :  { %2526 = vmatpush3.bf16.msra.mxu1 %v2525_v44  ;;  %2738 = vlog2.f32 %v527_v20  ;;  %v531_v25 = vadd.f32 1.0, %v530_v42  ;;  %v782_v30 = vld [vmem:[%s4330_s3 + $0x6a8] sm:$0xff]  ;;  %v795_v18 = vld [vmem:[%s4330_s3 + $0x710] sm:$0xff]  ;;  %v796_v40 = vld [vmem:[%s4330_s3 + $0x718] sm:$0xff]  ;;  %v2541_v43 = vpack.c.bf16 %v764_v15, %v763_v14 }
  0x8f   :  { %v2737_v8 = vpop.eup %2736  ;;  %2528 = vmatprep.subr.bf16.mxu1 %v2527_v48  ;;  %2740 = vpow2.f32 %v489_v1  ;;  %v813_v44 = vld [vmem:[%s4330_s3 + $0x7a0] sm:$0xff]  ;;  %vm3808_vm8 = vcmp.lt.f32.partialorder %v533_v32, 0.0004427343  ;;  %v766_v49 = vld [vmem:[%s4330_s3 + $0x628] sm:$0xff]  ;;  %v2573_v35 = vpack.c.bf16 %v796_v40, %v795_v18  ;;  %v815_v28 = vld [vmem:[%s4330_s3 + $0x7b0] sm:$0xff] }
  0x90   :  { %2498 = vmatpush3.bf16.msra.mxu0 %v2497_v57  ;;  %v566_v5 = vmul.f32 %v2737_v8, %v3247_v56  ;;  %v780_v56 = vld [vmem:[%s4330_s3 + $0x698] sm:$0xff]  ;;  %v532_v41 = vmul.f32 %v3705_v47, %v531_v25  ;;  %v2543_v47 = vpack.c.bf16 %v782_v30, %v781_v39  ;;  %v765_v48 = vld [vmem:[%s4330_s3 + $0x620] sm:$0xff]  ;;  %v783_v57 = vld [vmem:[%s4330_s3 + $0x6b0] sm:$0xff] }
  0x91   :  { %2500 = vmatprep.subr.bf16.mxu0 %v2499_v54  ;;  %v2539_v34 = vpack.c.bf16 %v780_v56, %v779_v16  ;;  %v797_v52 = vld [vmem:[%s4330_s3 + $0x720] sm:$0xff]  ;;  %v798_v20 = vld [vmem:[%s4330_s3 + $0x728] sm:$0xff]  ;;  %v2545_v55 = vpack.c.bf16 %v766_v49, %v765_v48  ;;  %v768_v61 = vld [vmem:[%s4330_s3 + $0x638] sm:$0xff] }
  0x92   :  { %2530 = vmatpush3.bf16.msra.mxu1 %v2529_v59  ;;  %v3759_v17 = vrot.slane %v566_v5, %v2984_v22  ;;  %v994_v19 = vcombine.high %v566_v5, %v566_v5  ;;  %v816_v59 = vld [vmem:[%s4330_s3 + $0x7b8] sm:$0xff]  ;;  %v2577_v62 = vpack.c.bf16 %v798_v20, %v797_v52  ;;  %v785_v42 = vld [vmem:[%s4330_s3 + $0x6c0] sm:$0xff]  ;;  %v786_v1 = vld [vmem:[%s4330_s3 + $0x6c8] sm:$0xff] }
  0x93   :  { %2532 = vmatprep.subr.bf16.mxu1 %v2531_v37  ;;  %v767_v37 = vld [vmem:[%s4330_s3 + $0x630] sm:$0xff]  ;;  %v2579_v63 = vpack.c.bf16 %v816_v59, %v815_v28  ;;  %v800_v5 = vld [vmem:[%s4330_s3 + $0x738] sm:$0xff]  ;;  %v817_v7 = vld [vmem:[%s4330_s3 + $0x7c0] sm:$0xff]  ;;  %v2551_v16 = vpack.c.bf16 %v786_v1, %v785_v42 }
  0x94   :  { %2502 = vmatpush3.bf16.msra.mxu0 %v2501_v3  ;;  %v1009_v58 = vcombine.high %v3759_v17, %v3759_v17  ;;  %v3776_v27 = vrot.slane %v994_v19, %v2984_v22  ;;  %v799_v4 = vld [vmem:[%s4330_s3 + $0x730] sm:$0xff]  ;;  %v818_v9 = vld [vmem:[%s4330_s3 + $0x7c8] sm:$0xff]  ;;  %v769_v56 = vld [vmem:[%s4330_s3 + $0x640] sm:$0xff] }
  0x95   :  { %2536 = vmatprep.subr.bf16.mxu0 %v2535_v6  ;;  %v2549_v6 = vpack.c.bf16 %v768_v61, %v767_v37  ;;  %v770_v19 = vld [vmem:[%s4330_s3 + $0x648] sm:$0xff]  ;;  %v787_v23 = vld [vmem:[%s4330_s3 + $0x6d0] sm:$0xff]  ;;  %v788_v24 = vld [vmem:[%s4330_s3 + $0x6d8] sm:$0xff]  ;;  %v2583_v25 = vpack.c.bf16 %v818_v9, %v817_v7 }
  0x96   :  { %2534 = vmatpush3.bf16.msra.mxu1 %v2533_v11  ;;  %v1010_v31 = vcombine.high %v3776_v27, %v3776_v27  ;;  %v802_v2 = vld [vmem:[%s4330_s3 + $0x748] sm:$0xff]  ;;  %v2553_v60 = vpack.c.bf16 %v770_v19, %v769_v56  ;;  %v820_v32 = vld [vmem:[%s4330_s3 + $0x7d8] sm:$0xff]  ;;  %v771_v14 = vld [vmem:[%s4330_s3 + $0x650] sm:$0xff] }
  0x97   :  { %1414 = vmatmul.mubr.f32.vlgmr.msra.gmra.mrb[4].mxu0 %v3621_v0  ;;  %2568 = vmatprep.subr.bf16.mxu1 %v2567_v21  ;;  %v814_v0 = vld [vmem:[%s4330_s3 + $0x7a8] sm:$0xff]  ;;  %v2581_v21 = vpack.c.bf16 %v800_v5, %v799_v4  ;;  %v772_v15 = vld [vmem:[%s4330_s3 + $0x658] sm:$0xff]  ;;  %v789_v39 = vld [vmem:[%s4330_s3 + $0x6e0] sm:$0xff] }
  0x98   :  { %v2739_v36 = vpop.eup %2738  ;;  %2538 = vmatpush3.bf16.msra.mxu0 %v2537_v26  ;;  %1553 = vmatprep.mubr.f32.mxu0 %v1009_v58  ;;  %v2575_v51 = vpack.c.bf16 %v814_v0, %v813_v44  ;;  %v801_v26 = vld [vmem:[%s4330_s3 + $0x740] sm:$0xff]  ;;  %v819_v58 = vld [vmem:[%s4330_s3 + $0x7d0] sm:$0xff]  ;;  %v790_v30 = vld [vmem:[%s4330_s3 + $0x6e8] sm:$0xff]  ;;  %v2557_v40 = vpack.c.bf16 %v772_v15, %v771_v14  ;;  %v454_v14 = vmax.f32 %v3669_v33, 0.0 }
  0x99   :  { %1484 = vmatmul.mubr.f32.vlgmr.msra.gmra.mrb[4].mxu1 %v3643_v10  ;;  %2540 = vmatprep.subr.bf16.mxu0 %v2539_v34  ;;  %v529_v50 = vmul.f32 0.6931472, %v2739_v36  ;;  %v784_v10 = vld [vmem:[%s4330_s3 + $0x6b8] sm:$0xff]  ;;  %v3841_v53 = vpop.eup %2740  ;;  %v2555_v34 = vpack.c.bf16 %v788_v24, %v787_v23  ;;  %v822_v36 = vld [vmem:[%s4330_s3 + $0x7e8] sm:$0xff]  ;;  %v2559_v44 = vpack.c.bf16 %v790_v30, %v789_v39  ;;  %v773_v0 = vld [vmem:[%s4330_s3 + $0x660] sm:$0xff] }
  0x9a   :  { %2570 = vmatpush3.bf16.msra.mxu1 %v2569_v38  ;;  %1623 = vmatprep.mubr.f32.mxu1 %v1010_v31  ;;  %v2547_v8 = vpack.c.bf16 %v784_v10, %v783_v57  ;;  %v536_v11 = vadd.f32 1.0, %v3841_v53  ;;  %v2585_v38 = vpack.c.bf16 %v802_v2, %v801_v26  ;;  %v2587_v31 = vpack.c.bf16 %v820_v32, %v819_v58  ;;  %v804_v18 = vld [vmem:[%s4330_s3 + $0x758] sm:$0xff]  ;;  %v791_v48 = vld [vmem:[%s4330_s3 + $0x6f0] sm:$0xff]  ;;  %v805_v57 = vld [vmem:[%s4330_s3 + $0x760] sm:$0xff] }
  0x9b   :  { %2572 = vmatprep.subr.bf16.mxu1 %v2571_v12  ;;  %v535_v54 = vsel %vm3808_vm8, %v532_v41, %v529_v50  ;;  %v803_v12 = vld [vmem:[%s4330_s3 + $0x750] sm:$0xff]  ;;  %v821_v41 = vld [vmem:[%s4330_s3 + $0x7e0] sm:$0xff]  ;;  %v539_v46 = vmul.f32 -0.5, %v3841_v53  ;;  %v792_v49 = vld [vmem:[%s4330_s3 + $0x6f8] sm:$0xff] }
  0x9c   :  { %2542 = vmatpush3.bf16.msra.mxu0 %v2541_v43  ;;  %v549_v29 = vadd.f32 %v535_v54, %v453_v45  ;;  %v774_v45 = vld [vmem:[%s4330_s3 + $0x668] sm:$0xff]  ;;  %v823_v52 = vld [vmem:[%s4330_s3 + $0x7f0] sm:$0xff]  ;;  %v2563_v20 = vpack.c.bf16 %v792_v49, %v791_v48  ;;  %v873_v4 = vld [vmem:[%s4330_s3 + $0x980] sm:$0xff] }
  0x9d   :  { %2544 = vmatprep.subr.bf16.mxu0 %v2543_v47  ;;  %v2589_v47 = vpack.c.bf16 %v804_v18, %v803_v12  ;;  %v806_v10 = vld [vmem:[%s4330_s3 + $0x768] sm:$0xff]  ;;  %v775_v54 = vld [vmem:[%s4330_s3 + $0x670] sm:$0xff]  ;;  %v540_v28 = vadd.f32 1.0, %v539_v46  ;;  %v825_v9 = vld [vmem:[%s4330_s3 + $0x800] sm:$0xff] }
  0x9e   :  { %2574 = vmatpush3.bf16.msra.mxu1 %v2573_v35  ;;  %v555_v3 = vsel %vm459_vm9, %v3571_v13, %v549_v29  ;;  %v2591_v35 = vpack.c.bf16 %v822_v36, %v821_v41  ;;  %v2593_v29 = vpack.c.bf16 %v806_v10, %v805_v57  ;;  %v842_v37 = vld [vmem:[%s4330_s3 + $0x888] sm:$0xff]  ;;  %v807_v1 = vld [vmem:[%s4330_s3 + $0x770] sm:$0xff]  ;;  %v844_v23 = vld [vmem:[%s4330_s3 + $0x898] sm:$0xff] }
  0x9f   :  { %2576 = vmatprep.subr.bf16.mxu1 %v2575_v51  ;;  %2742 = vtanh.f32 %v555_v3  ;;  %v2561_v51 = vpack.c.bf16 %v774_v45, %v773_v0  ;;  %v808_v3 = vld [vmem:[%s4330_s3 + $0x778] sm:$0xff]  ;;  %v874_v5 = vld [vmem:[%s4330_s3 + $0x988] sm:$0xff]  ;;  %v541_v56 = vmul.f32 %v3841_v53, %v540_v28  ;;  %v875_v58 = vld [vmem:[%s4330_s3 + $0x990] sm:$0xff] }
  0xa0   :  { %2546 = vmatpush3.bf16.msra.mxu0 %v2545_v55  ;;  %2744 = vlog2.f32 %v536_v11  ;;  %v776_v55 = vld [vmem:[%s4330_s3 + $0x678] sm:$0xff]  ;;  %v826_v11 = vld [vmem:[%s4330_s3 + $0x808] sm:$0xff]  ;;  %v2597_v19 = vpack.c.bf16 %v808_v3, %v807_v1  ;;  %v2631_v26 = vpack.c.bf16 %v874_v5, %v873_v4  ;;  %v845_v12 = vld [vmem:[%s4330_s3 + $0x8a0] sm:$0xff] }
  0xa1   :  { %2548 = vmatprep.subr.bf16.mxu0 %v2547_v8  ;;  %v841_v8 = vld [vmem:[%s4330_s3 + $0x880] sm:$0xff]  ;;  %v858_v2 = vld [vmem:[%s4330_s3 + $0x908] sm:$0xff]  ;;  %v876_v32 = vld [vmem:[%s4330_s3 + $0x998] sm:$0xff] }
  0xa2   :  { %2578 = vmatpush3.bf16.msra.mxu1 %v2577_v62  ;;  %v542_v62 = vand.u32 2147483647, %v3841_v53  ;;  %v2599_v7 = vpack.c.bf16 %v842_v37, %v841_v8  ;;  %v857_v53 = vld [vmem:[%s4330_s3 + $0x900] sm:$0xff]  ;;  %v828_v39 = vld [vmem:[%s4330_s3 + $0x818] sm:$0xff]  ;;  %v846_v18 = vld [vmem:[%s4330_s3 + $0x8a8] sm:$0xff]  ;;  %v2635_v41 = vpack.c.bf16 %v876_v32, %v875_v58 }
  0xa3   :  { %2580 = vmatprep.subr.bf16.mxu1 %v2579_v63  ;;  %v2565_v63 = vpack.c.bf16 %v776_v55, %v775_v54  ;;  %v859_v36 = vld [vmem:[%s4330_s3 + $0x910] sm:$0xff]  ;;  %v877_v0 = vld [vmem:[%s4330_s3 + $0x9a0] sm:$0xff]  ;;  %v2607_v46 = vpack.c.bf16 %v846_v18, %v845_v12  ;;  %v830_v48 = vld [vmem:[%s4330_s3 + $0x828] sm:$0xff] }
  0xa4   :  { %2550 = vmatpush3.bf16.msra.mxu0 %v2549_v6  ;;  %vm3990_vm10 = vcmp.lt.f32.partialorder %v542_v62, 0.0004427343  ;;  %v861_v57 = vld [vmem:[%s4330_s3 + $0x920] sm:$0xff]  ;;  %v862_v10 = vld [vmem:[%s4330_s3 + $0x928] sm:$0xff]  ;;  %v831_v55 = vld [vmem:[%s4330_s3 + $0x830] sm:$0xff] }
  0xa5   :  { %2552 = vmatprep.subr.bf16.mxu0 %v2551_v16  ;;  %v832_v28 = vld [vmem:[%s4330_s3 + $0x838] sm:$0xff]  ;;  %v850_v8 = vld [vmem:[%s4330_s3 + $0x8c8] sm:$0xff]  ;;  %v881_v1 = vld [vmem:[%s4330_s3 + $0x9c0] sm:$0xff] }
  0xa6   :  { %2582 = vmatpush3.bf16.msra.mxu1 %v2581_v21  ;;  %v843_v21 = vld [vmem:[%s4330_s3 + $0x890] sm:$0xff]  ;;  %v864_v62 = vld [vmem:[%s4330_s3 + $0x938] sm:$0xff]  ;;  %v882_v3 = vld [vmem:[%s4330_s3 + $0x9c8] sm:$0xff] }
  0xa7   :  { %2584 = vmatprep.subr.bf16.mxu1 %v2583_v25  ;;  %v2603_v15 = vpack.c.bf16 %v844_v23, %v843_v21  ;;  %v833_v4 = vld [vmem:[%s4330_s3 + $0x840] sm:$0xff]  ;;  %v834_v5 = vld [vmem:[%s4330_s3 + $0x848] sm:$0xff]  ;;  %v883_v23 = vld [vmem:[%s4330_s3 + $0x9d0] sm:$0xff] }
  0xa8   :  { %2554 = vmatpush3.bf16.msra.mxu0 %v2553_v60  ;;  %v2601_v60 = vpack.c.bf16 %v826_v11, %v825_v9  ;;  %v851_v9 = vld [vmem:[%s4330_s3 + $0x8d0] sm:$0xff]  ;;  %v852_v11 = vld [vmem:[%s4330_s3 + $0x8d8] sm:$0xff]  ;;  %v2617_v21 = vpack.c.bf16 %v834_v5, %v833_v4  ;;  %v853_v58 = vld [vmem:[%s4330_s3 + $0x8e0] sm:$0xff] }
  0xa9   :  { %v2743_v43 = vpop.eup %2742  ;;  %2556 = vmatprep.subr.bf16.mxu0 %v2555_v34  ;;  %v884_v25 = vld [vmem:[%s4330_s3 + $0x9d8] sm:$0xff]  ;;  %v854_v32 = vld [vmem:[%s4330_s3 + $0x8e8] sm:$0xff]  ;;  %v837_v18 = vld [vmem:[%s4330_s3 + $0x860] sm:$0xff] }
  0xaa   :  { %2586 = vmatpush3.bf16.msra.mxu1 %v2585_v38  ;;  %v567_v50 = vmul.f32 %v2743_v43, %v3571_v13  ;;  %v824_v13 = vld [vmem:[%s4330_s3 + $0x7f8] sm:$0xff]  ;;  %v2745_v59 = vpop.eup %2744  ;;  %v827_v38 = vld [vmem:[%s4330_s3 + $0x810] sm:$0xff]  ;;  %v2623_v12 = vpack.c.bf16 %v854_v32, %v853_v58  ;;  %v909_v4 = vld [vmem:[%s4330_s3 + $0xaa0] sm:$0xff] }
  0xab   :  { %2588 = vmatprep.subr.bf16.mxu1 %v2587_v31  ;;  %v2595_v42 = vpack.c.bf16 %v824_v13, %v823_v52  ;;  %v538_v16 = vmul.f32 0.6931472, %v2745_v59  ;;  %v2633_v31 = vpack.c.bf16 %v858_v2, %v857_v53  ;;  %v860_v43 = vld [vmem:[%s4330_s3 + $0x918] sm:$0xff]  ;;  %v879_v52 = vld [vmem:[%s4330_s3 + $0x9b0] sm:$0xff]  ;;  %v2641_v59 = vpack.c.bf16 %v862_v10, %v861_v57  ;;  %v905_v57 = vld [vmem:[%s4330_s3 + $0xa80] sm:$0xff] }
  0xac   :  { %2558 = vmatpush3.bf16.msra.mxu0 %v2557_v40  ;;  %v1011_v61 = vcombine.high %v567_v50, %v567_v50  ;;  %v3972_v6 = vrot.slane %v567_v50, %v2984_v22  ;;  %v2637_v49 = vpack.c.bf16 %v860_v43, %v859_v36  ;;  %v847_v50 = vld [vmem:[%s4330_s3 + $0x8b0] sm:$0xff]  ;;  %v880_v13 = vld [vmem:[%s4330_s3 + $0x9b8] sm:$0xff]  ;;  %v910_v5 = vld [vmem:[%s4330_s3 + $0xaa8] sm:$0xff] }
  0xad   :  { %2560 = vmatprep.subr.bf16.mxu0 %v2559_v44  ;;  %v544_v30 = vsel %vm3990_vm10, %v541_v56, %v538_v16  ;;  %v2605_v44 = vpack.c.bf16 %v828_v39, %v827_v38  ;;  %v2643_v37 = vpack.c.bf16 %v880_v13, %v879_v52  ;;  %v2647_v16 = vpack.c.bf16 %v882_v3, %v881_v1  ;;  %v865_v56 = vld [vmem:[%s4330_s3 + $0x940] sm:$0xff]  ;;  %v835_v53 = vld [vmem:[%s4330_s3 + $0x850] sm:$0xff]  ;;  %v836_v2 = vld [vmem:[%s4330_s3 + $0x858] sm:$0xff] }
  0xae   :  { %2590 = vmatpush3.bf16.msra.mxu1 %v2589_v47  ;;  %v3988_v24 = vrot.slane %v1011_v61, %v2984_v22  ;;  %v1026_v34 = vcombine.high %v3972_v6, %v3972_v6  ;;  %v550_v45 = vadd.f32 %v544_v30, %v454_v14  ;;  %v829_v47 = vld [vmem:[%s4330_s3 + $0x820] sm:$0xff]  ;;  %v863_v61 = vld [vmem:[%s4330_s3 + $0x930] sm:$0xff]  ;;  %v2621_v38 = vpack.c.bf16 %v836_v2, %v835_v53  ;;  %v886_v30 = vld [vmem:[%s4330_s3 + $0x9e8] sm:$0xff] }
  0xaf   :  { %2592 = vmatprep.subr.bf16.mxu1 %v2591_v35  ;;  %v867_v14 = vld [vmem:[%s4330_s3 + $0x950] sm:$0xff]  ;;  %v885_v39 = vld [vmem:[%s4330_s3 + $0x9e0] sm:$0xff]  ;;  %v856_v43 = vld [vmem:[%s4330_s3 + $0x8f8] sm:$0xff] }
  0xb0   :  { %2562 = vmatpush3.bf16.msra.mxu0 %v2561_v51  ;;  %v1027_v40 = vcombine.high %v3988_v24, %v3988_v24  ;;  %v2609_v51 = vpack.c.bf16 %v830_v48, %v829_v47  ;;  %v855_v36 = vld [vmem:[%s4330_s3 + $0x8f0] sm:$0xff]  ;;  %v888_v47 = vld [vmem:[%s4330_s3 + $0x9f8] sm:$0xff]  ;;  %v925_v53 = vld [vmem:[%s4330_s3 + $0xb20] sm:$0xff] }
  0xb1   :  { %2564 = vmatprep.subr.bf16.mxu0 %v2563_v20  ;;  %v556_v20 = vsel %vm460_vm11, %v3669_v33, %v550_v45  ;;  %v872_v52 = vld [vmem:[%s4330_s3 + $0x978] sm:$0xff]  ;;  %v891_v3 = vld [vmem:[%s4330_s3 + $0xa10] sm:$0xff]  ;;  %v926_v2 = vld [vmem:[%s4330_s3 + $0xb28] sm:$0xff] }
  0xb2   :  { %2594 = vmatpush3.bf16.msra.mxu1 %v2593_v29  ;;  %v849_v29 = vld [vmem:[%s4330_s3 + $0x8c0] sm:$0xff]  ;;  %2746 = vtanh.f32 %v556_v20  ;;  %v895_v32 = vld [vmem:[%s4330_s3 + $0xa30] sm:$0xff] }
  0xb3   :  { %2596 = vmatprep.subr.bf16.mxu1 %v2595_v42  ;;  %v2613_v42 = vpack.c.bf16 %v832_v28, %v831_v55  ;;  %v889_v55 = vld [vmem:[%s4330_s3 + $0xa00] sm:$0xff]  ;;  %v890_v28 = vld [vmem:[%s4330_s3 + $0xa08] sm:$0xff] }
  0xb4   :  { %2566 = vmatpush3.bf16.msra.mxu0 %v2565_v63  ;;  %v2615_v63 = vpack.c.bf16 %v850_v8, %v849_v29  ;;  %v907_v29 = vld [vmem:[%s4330_s3 + $0xa90] sm:$0xff]  ;;  %v908_v8 = vld [vmem:[%s4330_s3 + $0xa98] sm:$0xff] }
  0xb5   :  { %2600 = vmatprep.subr.bf16.mxu0 %v2599_v7  ;;  %v2645_v7 = vpack.c.bf16 %v864_v62, %v863_v61  ;;  %v922_v61 = vld [vmem:[%s4330_s3 + $0xb08] sm:$0xff]  ;;  %v2665_v62 = vpack.c.bf16 %v890_v28, %v889_v55  ;;  %v2667_v1 = vpack.c.bf16 %v908_v8, %v907_v29 }
  0xb6   :  { %2598 = vmatpush3.bf16.msra.mxu1 %v2597_v19  ;;  %v866_v19 = vld [vmem:[%s4330_s3 + $0x948] sm:$0xff] }
  0xb7   :  { %1554 = vmatmul.mubr.f32.vlgmr.msra.gmra.mrb[6].mxu0 %v3759_v17  ;;  %2632 = vmatprep.subr.bf16.mxu1 %v2631_v26  ;;  %v878_v17 = vld [vmem:[%s4330_s3 + $0x9a8] sm:$0xff]  ;;  %v2619_v26 = vpack.c.bf16 %v852_v11, %v851_v9  ;;  %v2773_v9 = vmov 0.0|0.0   ;;  %v923_v11 = vld [vmem:[%s4330_s3 + $0xb10] sm:$0xff] }
  0xb8   :  { %2602 = vmatpush3.bf16.msra.mxu0 %v2601_v60  ;;  %1693 = vmatprep.mubr.f32.mxu0 %v1026_v34  ;;  %v2639_v35 = vpack.c.bf16 %v878_v17, %v877_v0  ;;  %v2649_v60 = vpack.c.bf16 %v866_v19, %v865_v56  ;;  %v2651_v34 = vpack.c.bf16 %v884_v25, %v883_v23  ;;  %v869_v0 = vld [vmem:[%s4330_s3 + $0x960] sm:$0xff]  ;;  %v870_v17 = vld [vmem:[%s4330_s3 + $0x968] sm:$0xff]  ;;  %v911_v23 = vld [vmem:[%s4330_s3 + $0xab0] sm:$0xff] }
  0xb9   :  { %1624 = vmatmul.mubr.f32.vlgmr.msra.gmra.mrb[6].mxu1 %v3776_v27  ;;  %2604 = vmatprep.subr.bf16.mxu0 %v2603_v15  ;;  %v848_v27 = vld [vmem:[%s4330_s3 + $0x8b8] sm:$0xff]  ;;  %v2671_v19 = vpack.c.bf16 %v910_v5, %v909_v4 }
  0xba   :  { %2634 = vmatpush3.bf16.msra.mxu1 %v2633_v31  ;;  %1763 = vmatprep.mubr.f32.mxu1 %v1027_v40  ;;  %v2611_v54 = vpack.c.bf16 %v848_v27, %v847_v50  ;;  %v868_v15 = vld [vmem:[%s4330_s3 + $0x958] sm:$0xff]  ;;  %v838_v40 = vld [vmem:[%s4330_s3 + $0x868] sm:$0xff]  ;;  %v839_v50 = vld [vmem:[%s4330_s3 + $0x870] sm:$0xff] }
  0xbb   :  { %2636 = vmatprep.subr.bf16.mxu1 %v2635_v41  ;;  %v2653_v41 = vpack.c.bf16 %v868_v15, %v867_v14  ;;  %v2625_v45 = vpack.c.bf16 %v838_v40, %v837_v18  ;;  %v840_v27 = vld [vmem:[%s4330_s3 + $0x878] sm:$0xff]  ;;  %v913_v14 = vld [vmem:[%s4330_s3 + $0xac0] sm:$0xff]  ;;  %v914_v15 = vld [vmem:[%s4330_s3 + $0xac8] sm:$0xff] }
  0xbc   :  { %2606 = vmatpush3.bf16.msra.mxu0 %v2605_v44  ;;  %v2747_v31 = vpop.eup %2746  ;;  %v2655_v44 = vpack.c.bf16 %v886_v30, %v885_v39  ;;  %v2629_v13 = vpack.c.bf16 %v840_v27, %v839_v50  ;;  %v912_v25 = vld [vmem:[%s4330_s3 + $0xab8] sm:$0xff]  ;;  %v927_v39 = vld [vmem:[%s4330_s3 + $0xb30] sm:$0xff]  ;;  %v897_v18 = vld [vmem:[%s4330_s3 + $0xa40] sm:$0xff] }
  0xbd   :  { %2608 = vmatprep.subr.bf16.mxu0 %v2607_v46  ;;  %v887_v46 = vld [vmem:[%s4330_s3 + $0x9f0] sm:$0xff]  ;;  %v4163_v48 = vmul.f32 %v2747_v31, %v3669_v33  ;;  %v906_v33 = vld [vmem:[%s4330_s3 + $0xa88] sm:$0xff]  ;;  %v2675_v58 = vpack.c.bf16 %v912_v25, %v911_v23  ;;  %v928_v30 = vld [vmem:[%s4330_s3 + $0xb38] sm:$0xff] }
  0xbe   :  { %2638 = vmatpush3.bf16.msra.mxu1 %v2637_v49  ;;  %v2627_v49 = vpack.c.bf16 %v856_v43, %v855_v36  ;;  %v2659_v10 = vpack.c.bf16 %v888_v47, %v887_v46  ;;  %v898_v40 = vld [vmem:[%s4330_s3 + $0xa48] sm:$0xff]  ;;  %v916_v36 = vld [vmem:[%s4330_s3 + $0xad8] sm:$0xff]  ;;  %v2705_v43 = vpack.c.bf16 %v928_v30, %v927_v39  ;;  %v917_v47 = vld [vmem:[%s4330_s3 + $0xae0] sm:$0xff] }
  0xbf   :  { %2640 = vmatprep.subr.bf16.mxu1 %v2639_v35  ;;  %v2657_v35 = vpack.c.bf16 %v870_v17, %v869_v0  ;;  %v4185_v20 = vrot.slane %v4163_v48, %v2984_v22  ;;  %v2681_v0 = vpack.c.bf16 %v898_v40, %v897_v18  ;;  %v900_v46 = vld [vmem:[%s4330_s3 + $0xa58] sm:$0xff] }
  0xc0   :  { %2610 = vmatpush3.bf16.msra.mxu0 %v2609_v51  ;;  %v871_v51 = vld [vmem:[%s4330_s3 + $0x970] sm:$0xff] }
  0xc1   :  { %2612 = vmatprep.subr.bf16.mxu0 %v2611_v54  ;;  %v2663_v54 = vpack.c.bf16 %v906_v33, %v905_v57  ;;  %v901_v57 = vld [vmem:[%s4330_s3 + $0xa60] sm:$0xff]  ;;  %v902_v33 = vld [vmem:[%s4330_s3 + $0xa68] sm:$0xff] }
  0xc2   :  { %2642 = vmatpush3.bf16.msra.mxu1 %v2641_v59  ;;  %v2661_v59 = vpack.c.bf16 %v872_v52, %v871_v51  ;;  %v2689_v51 = vpack.c.bf16 %v902_v33, %v901_v57 }
  0xc3   :  { %2644 = vmatprep.subr.bf16.mxu1 %v2643_v37  ;;  %v921_v37 = vld [vmem:[%s4330_s3 + $0xb00] sm:$0xff] }
  0xc4   :  { %2614 = vmatpush3.bf16.msra.mxu0 %v2613_v42  ;;  %v1043_v42 = vcombine.high %v4185_v20, %v4185_v20 }
  0xc5   :  { %2616 = vmatprep.subr.bf16.mxu0 %v2615_v63  ;;  %v892_v63 = vld [vmem:[%s4330_s3 + $0xa18] sm:$0xff] }
  0xc6   :  { %2646 = vmatpush3.bf16.msra.mxu1 %v2645_v7  ;;  %v2696_v7 = vpack.c.bf16 %v922_v61, %v921_v37  ;;  %v2669_v56 = vpack.c.bf16 %v892_v63, %v891_v3 }
  0xc7   :  { %2648 = vmatprep.subr.bf16.mxu1 %v2647_v16  ;;  %v924_v16 = vld [vmem:[%s4330_s3 + $0xb18] sm:$0xff] }
  0xc8   :  { %2618 = vmatpush3.bf16.msra.mxu0 %v2617_v21  ;;  %v894_v21 = vld [vmem:[%s4330_s3 + $0xa28] sm:$0xff] }
  0xc9   :  { %2620 = vmatprep.subr.bf16.mxu0 %v2619_v26  ;;  %v2775_v26 = vmov 0.0  }
  0xca   :  { %2650 = vmatpush3.bf16.msra.mxu1 %v2649_v60 }
  0xcb   :  { %2652 = vmatprep.subr.bf16.mxu1 %v2651_v34  ;;  %v896_v34 = vld [vmem:[%s4330_s3 + $0xa38] sm:$0xff] }
  0xcc   :  { %2622 = vmatpush3.bf16.msra.mxu0 %v2621_v38  ;;  %v2702_v38 = vpack.c.bf16 %v926_v2, %v925_v53  ;;  %v2677_v31 = vpack.c.bf16 %v896_v34, %v895_v32 }
  0xcd   :  { %2624 = vmatprep.subr.bf16.mxu0 %v2623_v12  ;;  %v2679_v12 = vpack.c.bf16 %v914_v15, %v913_v14 }
  0xce   :  { %2654 = vmatpush3.bf16.msra.mxu1 %v2653_v41  ;;  %v915_v41 = vld [vmem:[%s4330_s3 + $0xad0] sm:$0xff] }
  0xcf   :  { %2656 = vmatprep.subr.bf16.mxu1 %v2655_v44  ;;  %v1028_v44 = vcombine.high %v4163_v48, %v4163_v48  ;;  %v2683_v17 = vpack.c.bf16 %v916_v36, %v915_v41  ;;  %v918_v48 = vld [vmem:[%s4330_s3 + $0xae8] sm:$0xff] }
  0xd0   :  { %2626 = vmatpush3.bf16.msra.mxu0 %v2625_v45  ;;  %v899_v45 = vld [vmem:[%s4330_s3 + $0xa50] sm:$0xff] }
  0xd1   :  { %2628 = vmatprep.subr.bf16.mxu0 %v2627_v49  ;;  %v929_v49 = vld [vmem:[%s4330_s3 + $0xb40] sm:$0xff]  ;;  %v1042_v50 = vrot.slane %v1028_v44, %v2984_v22  ;;  %v2685_v27 = vpack.c.bf16 %v900_v46, %v899_v45  ;;  %v920_v22 = vld [vmem:[%s4330_s3 + $0xaf8] sm:$0xff] }
  0xd2   :  { %2658 = vmatpush3.bf16.msra.mxu1 %v2657_v35  ;;  %v2687_v35 = vpack.c.bf16 %v918_v48, %v917_v47 }
  0xd3   :  { %2660 = vmatprep.subr.bf16.mxu1 %v2659_v10  ;;  %v919_v10 = vld [vmem:[%s4330_s3 + $0xaf0] sm:$0xff] }
  0xd4   :  { %2630 = vmatpush3.bf16.msra.mxu0 %v2629_v13  ;;  %v2691_v52 = vpack.c.bf16 %v920_v22, %v919_v10  ;;  %v903_v13 = vld [vmem:[%s4330_s3 + $0xa70] sm:$0xff] }
  0xd5   :  { %2664 = vmatprep.subr.bf16.mxu0 %v2663_v54  ;;  %v904_v54 = vld [vmem:[%s4330_s3 + $0xa78] sm:$0xff] }
  0xd6   :  { %2662 = vmatpush3.bf16.msra.mxu1 %v2661_v59  ;;  %v2693_v55 = vpack.c.bf16 %v904_v54, %v903_v13  ;;  %v1925_v59 = vld [vmem:[%s4331_s4] ss:$0 sm:$0xff] }
  0xd7   :  { %1694 = vmatmul.mubr.f32.vlgmr.msra.gmra.mrb[8].mxu0 %v3972_v6  ;;  %2695 = vmatprep.subr.bf16.mxu1 %v2773_v9  ;;  %v893_v6 = vld [vmem:[%s4330_s3 + $0xa20] sm:$0xff]  ;;  %s2776_s3 = smov [#allocation2]  }
  0xd8   :  { %2666 = vmatpush3.bf16.msra.mxu0 %v2665_v62  ;;  %1833 = vmatprep.mubr.f32.mxu0 %v1043_v42  ;;  %v2673_v60 = vpack.c.bf16 %v894_v21, %v893_v6  ;;  %s1917_s4 = sshll.u32 %s2776_s3, 4  ;;  %s1918_s4 = int_to_ptr.vmem [resolvable:$true] %s1917_s4 }
  0xd9   :  { %1764 = vmatmul.mubr.f32.vlgmr.msra.gmra.mrb[8].mxu1 %v3988_v24  ;;  %2668 = vmatprep.subr.bf16.mxu0 %v2667_v1  ;;  %v2699_v24 = vpack.c.bf16 %v924_v16, %v923_v11  ;;  %s2748_s17 = scalar_lea.vmem %s1918_s4, 32  ;;  %p2753_p1 = scmp.lt.s32.totalorder %s1918_s4, %s1918_s4 }
  0xda   :  { %2697 = vmatpush3.bf16.msra.mxu1 %v2696_v7  ;;  %2340 = vmatprep.mubr.msk.f32.mxu1 %vm2774_vm12, %v2775_v26  ;;  %p2749_p0 = scmp.ne.s32.totalorder %s1918_s4, %s2748_s17  ;;  %p2754_p2 = scmp.lt.s32.totalorder %s2748_s17, %s2748_s17 }
  0xdb   :  { %2698 = vmatprep.subr.bf16.mxu1 %v2773_v9 }
  0xdc   :  { %2670 = vmatpush3.bf16.msra.mxu0 %v2669_v56  ;;  %p2755_p3 = por %p2754_p2, %p2753_p1 }
  0xdd   :  { %2672 = vmatprep.subr.bf16.mxu0 %v2671_v19 }
  0xde   :  { %2700 = vmatpush3.bf16.msra.mxu1 %v2699_v24  ;;  %p2756_p4 = pnand %p2755_p3, %p2749_p0 }
  0xdf   :  { %2701 = vmatprep.subr.bf16.mxu1 %v2773_v9 }
  0xe0   :  { %2674 = vmatpush3.bf16.msra.mxu0 %v2673_v60 }
  0xe1   :  { %2676 = vmatprep.subr.bf16.mxu0 %v2675_v58 }
  0xe2   :  { %2703 = vmatpush3.bf16.msra.mxu1 %v2702_v38 }
  0xe3   :  { %2704 = vmatprep.subr.bf16.mxu1 %v2773_v9 }
  0xe4   :  { %2678 = vmatpush3.bf16.msra.mxu0 %v2677_v31 }
  0xe5   :  { %2680 = vmatprep.subr.bf16.mxu0 %v2679_v12 }
  0xe6   :  { %2706 = vmatpush3.bf16.msra.mxu1 %v2705_v43 }
  0xe7   :  { %2338 = vmatprep.subr.mxu1 %v2775_v26 }
  0xe8   :  { %2682 = vmatpush3.bf16.msra.mxu0 %v2681_v0 }
  0xe9   :  { %2684 = vmatprep.subr.bf16.mxu0 %v2683_v17 }
  0xea   :  { %2339 = vmatpush3.msra.mxu1 %v929_v49 }
  0xeb   :  { %2341 = vmatmul.mubr.msk.f32.vlgmr.msra.gmra.mrb[10].mxu1 %vm1066_vm13, %v1042_v50 }
  0xec   :  { %2686 = vmatpush3.bf16.msra.mxu0 %v2685_v27 }
  0xed   :  { %2688 = vmatprep.subr.bf16.mxu0 %v2687_v35 }
  0xf0   :  { %2690 = vmatpush3.bf16.msra.mxu0 %v2689_v51 }
  0xf1   :  { %2692 = vmatprep.subr.bf16.mxu0 %v2691_v52 }
  0xf4   :  { %2694 = vmatpush3.bf16.msra.mxu0 %v2693_v55 }
  0xf7   :  { %1834 = vmatmul.mubr.f32.vlgmr.msra.gmra.mrb[10].mxu0 %v4185_v20 }
 0x12a   :  { %v1959_v28 = vpop.f32.mrb[0].mxu0 }
 0x12b   :  { %v1960_v29 = vpop.f32.mrb[1].mxu0 }
 0x12c   :  { %v1961_v8 = vadd.f32 %v1960_v29, %v1959_v28  ;;  %v1994_v37 = vpop.f32.mrb[0].mxu1 }
 0x12d   :  { %v1995_v61 = vpop.f32.mrb[1].mxu1 }
 0x12e   :  { %v1136_v62 = vadd.f32 %v1961_v8, %v1925_v59  ;;  %v1996_v42 = vadd.f32 %v1995_v61, %v1994_v37 }
 0x130   :  { %v1206_v1 = vadd.f32 %v1996_v42, %v1136_v62 }
 0x14a   :  { %v2029_v3 = vpop.f32.mrb[2].mxu0 }
 0x14b   :  { %v2030_v63 = vpop.f32.mrb[3].mxu0 }
 0x14c   :  { %v2031_v4 = vadd.f32 %v2030_v63, %v2029_v3  ;;  %v2064_v5 = vpop.f32.mrb[2].mxu1 }
 0x14d   :  { %v2065_v7 = vpop.f32.mrb[3].mxu1 }
 0x14e   :  { %v1276_v9 = vadd.f32 %v2031_v4, %v1206_v1  ;;  %v2066_v11 = vadd.f32 %v2065_v7, %v2064_v5 }
 0x150   :  { %v1346_v20 = vadd.f32 %v2066_v11, %v1276_v9 }
 0x16a   :  { %v2099_v16 = vpop.f32.mrb[4].mxu0 }
 0x16b   :  { %v2100_v56 = vpop.f32.mrb[5].mxu0 }
 0x16c   :  { %v2101_v19 = vadd.f32 %v2100_v56, %v2099_v16  ;;  %v2134_v6 = vpop.f32.mrb[4].mxu1 }
 0x16d   :  { %v2135_v21 = vpop.f32.mrb[5].mxu1 }
 0x16e   :  { %v1416_v23 = vadd.f32 %v2101_v19, %v1346_v20  ;;  %v2136_v25 = vadd.f32 %v2135_v21, %v2134_v6 }
 0x170   :  { %v1486_v24 = vadd.f32 %v2136_v25, %v1416_v23 }
 0x18a   :  { %v2169_v26 = vpop.f32.mrb[6].mxu0 }
 0x18b   :  { %v2170_v53 = vpop.f32.mrb[7].mxu0 }
 0x18c   :  { %v2171_v2 = vadd.f32 %v2170_v53, %v2169_v26  ;;  %v2204_v60 = vpop.f32.mrb[6].mxu1 }
 0x18d   :  { %v2205_v58 = vpop.f32.mrb[7].mxu1 }
 0x18e   :  { %v1556_v32 = vadd.f32 %v2171_v2, %v1486_v24  ;;  %v2206_v34 = vadd.f32 %v2205_v58, %v2204_v60 }
 0x190   :  { %v1626_v14 = vadd.f32 %v2206_v34, %v1556_v32 }
 0x1aa   :  { %v2239_v15 = vpop.f32.mrb[8].mxu0 }
 0x1ab   :  { %v2240_v38 = vpop.f32.mrb[9].mxu0 }
 0x1ac   :  { %v2241_v39 = vadd.f32 %v2240_v38, %v2239_v15  ;;  %v2274_v30 = vpop.f32.mrb[8].mxu1 }
 0x1ad   :  { %v2275_v31 = vpop.f32.mrb[9].mxu1 }
 0x1ae   :  { %v1696_v12 = vadd.f32 %v2241_v39, %v1626_v14  ;;  %v2276_v18 = vadd.f32 %v2275_v31, %v2274_v30 }
 0x1b0   :  { %v1766_v40 = vadd.f32 %v2276_v18, %v1696_v12 }
 0x1be   :  { %v1905_v41 = vpop.f32.mrb[10].mxu1 }
 0x1bf   :  { %v2342_v36 = vpop.f32.mrb[11].mxu1 }
 0x1ca   :  { %v2309_v43 = vpop.f32.mrb[10].mxu0 }
 0x1cb   :  { %v2310_v44 = vpop.f32.mrb[11].mxu0 }
 0x1cc   :  { %v2311_v0 = vadd.f32 %v2310_v44, %v2309_v43 }
 0x1ce   :  { %v1836_v17 = vadd.f32 %v2311_v0, %v1766_v40 }
 0x1d0   :  { %v1906_v45 = vadd.f32 %v1905_v41, %v1836_v17 }
 0x1d2   :  { %1910 = vst.msk [vmem:[#allocation2] sm:$0x3] %vm1909_vm14, %v1906_v45 }
 0x1d3   :  { %2759 = shalt.err (!%p2756_p4)
}
 0x1d4   :  { %s2760_s20 = scalar_lea.hbm %s4332_s5, 32 }
 0x1d5   :  { %p2761_p5 = scmp.ne.s32.totalorder %s4332_s5, %s2760_s20  ;;  %p2764_p6 = scmp.lt.u32.totalorder %s2760_s20, %s4332_s5 }
 0x1d7   :  { %p2766_p7 = pnand %p2764_p6, %p2761_p5 }
 0x1d9   :  { %2769 = shalt.err (!%p2766_p7)
}
 0x1da   :  { %1920 = dma.vmem_to_hbm [thread:$0]  %s1918_s4, 32, %s4332_s5, [#allocation3]  }
 0x1db   :  { %2770 = dma.done.wait [#allocation3], 32  }
 0x1dc   :  { %2771 = vsyncadd [#allocation3], 4294967264 }
 0x1dd   :  { %1924 = vsyncpa [#allocation3], 1 }

</bundles_post_ra>
